<compile_context>
chip_gen: v7x
topology: tpu7x:2x2x1
jax: 0.10.0
libtpu: 0.0.40
codegen_flags: <defaults>
</compile_context>

<pallas_src>
import jax
import jax.numpy as jnp
from jax.experimental import pallas as pl
from jax.experimental.pallas import tpu as pltpu


# ----------------------------- kernel bodies ------------------------------ #

def _conv3x3_relu(x, w_ref, b_ref, out_dtype):
    """3x3 VALID conv + bias + ReLU on an NHWC bf16 tile.

    x     : (NB, H, W, C)  bfloat16 values (already loaded)
    w_ref : (9*C, Co)      bf16 ref, row index = (kh*3 + kw)*C + cin
    b_ref : (1, Co)        f32 ref
    returns (NB, H-2, W-2, Co) in out_dtype.
    """
    nb, h, w, c = x.shape
    co = w_ref.shape[1]
    ho, wo = h - 2, w - 2
    m = nb * ho * wo
    if c >= 128:
        # Per-tap accumulation: K = C keeps the MXU full and avoids the 9x
        # im2col intermediate (the key VMEM lever for deep blocks).
        acc = None
        for t in range(9):
            dh, dw = divmod(t, 3)
            tap = x[:, dh:dh + ho, dw:dw + wo, :].reshape(m, c)
            part = jnp.dot(tap, w_ref[t * c:(t + 1) * c, :],
                           preferred_element_type=jnp.float32)
            acc = part if acc is None else acc + part
        y = acc
    else:
        # Small C: one im2col matmul so K = 9*C is large enough for the MXU.
        patches = jnp.concatenate(
            [x[:, dh:dh + ho, dw:dw + wo, :]
             for dh in range(3) for dw in range(3)], axis=-1)
        y = jnp.dot(patches.reshape(m, 9 * c), w_ref[...],
                    preferred_element_type=jnp.float32)
    y = jnp.maximum(y + b_ref[...], 0.0)            # f32 bias + ReLU (VPU)
    return y.reshape(nb, ho, wo, co).astype(out_dtype)


def _double_conv(x, w1_ref, b1_ref, w2_ref, b2_ref, o_ref):
    h1 = _conv3x3_relu(x, w1_ref, b1_ref, jnp.bfloat16)
    o_ref[...] = _conv3x3_relu(h1, w2_ref, b2_ref, o_ref.dtype)


def _block_kernel(x_ref, w1_ref, b1_ref, w2_ref, b2_ref, o_ref):
    """Whole-image (or whole-rows) tile, input auto-pipelined by BlockSpec."""
    _double_conv(x_ref[...], w1_ref, b1_ref, w2_ref, b2_ref, o_ref)


def _block_kernel_halo(x_hbm, w1_ref, b1_ref, w2_ref, b2_ref, o_ref,
                       xbuf, sem):
    """Row-tiled variant: manual halo DMA of the input window from HBM."""
    b = pl.program_id(0)
    h = pl.program_id(1)
    nb, th_in = xbuf.shape[0], xbuf.shape[1]
    th_out = th_in - 4
    # TODO(synk): double-buffer this input DMA; output/weight streams are
    # still auto-pipelined by their BlockSpecs.
    cp = pltpu.make_async_copy(
        x_hbm.at[pl.ds(b * nb, nb), pl.ds(h * th_out, th_in)], xbuf, sem)
    cp.start()
    cp.wait()
    _double_conv(xbuf[...], w1_ref, b1_ref, w2_ref, b2_ref, o_ref)


# ----------------------------- tiling heuristics --------------------------- #

def _round_up(x, m):
    return (x + m - 1) // m * m


def _divisors_desc(n):
    return [d for d in range(n, 0, -1) if n % d == 0]


def _tile_vmem_bytes(nb, th_out, w, cin, c1, cp):
    """Rough per-grid-step VMEM working set (bytes) for an (nb, th_out) tile,
    including the im2col / per-tap intermediates."""
    th_in = th_out + 4
    h1r, w1c = th_out + 2, w - 2
    h2r, w2c = th_out, w - 4
    in_blk = nb * th_in * w * cin * 2                 # bf16 input block
    out_blk = nb * h2r * w2c * cp * 4                 # f32 output block
    c1_patch = nb * h1r * w1c * (9 * cin if cin < 128 else cin) * 2
    h1_bytes = nb * h1r * w1c * c1 * (4 + 2)          # f32 acc + bf16 copy
    c2_patch = nb * h2r * w2c * (9 * c1 if c1 < 128 else c1) * 2
    out_f32 = nb * h2r * w2c * cp * 4
    # input/output blocks are double-buffered by the pipeline
    return 2 * in_blk + 2 * out_blk + c1_patch + h1_bytes + c2_patch + out_f32


def _pick_tiles(n_batch, h_out, budget, tile_bytes):
    """Pick (NB images, TH output rows) per grid step.

    Preference order: fit the budget, >=2 grid steps (pipelining / megacore),
    an even total step count (v7x has 2 TensorCores), then the largest tile
    (amortizes the ~0.35us per-step overhead)."""
    # 1) whole image per step, tile only the batch.
    feas = [nb for nb in _divisors_desc(n_batch)
            if tile_bytes(nb, h_out) <= budget]
    if feas:
        good = [nb for nb in feas
                if n_batch // nb >= 2 and (n_batch // nb) % 2 == 0]
        ok = [nb for nb in feas if n_batch // nb >= 2]
        nb = (good or ok or feas)[0]          # lists are descending in nb
        th = h_out
        # Single-step case (e.g. N == 1): split rows so the pipeline and both
        # v7x cores get work, when the 4-row halo recompute is negligible.
        if (n_batch // nb == 1 and h_out % 2 == 0 and h_out // 2 >= 64
                and tile_bytes(nb, h_out // 2) <= budget):
            th = h_out // 2
        return nb, th
    # 2) one image doesn't fit: batch of 1 + halo row tiling.
    hdivs = [d for d in _divisors_desc(h_out) if tile_bytes(1, d) <= budget]
    if not hdivs:
        # TODO(synk): add column (W) tiling for extreme widths.
        return 1, 1
    th = hdivs[0]
    total = n_batch * (h_out // th)
    if total > 1 and total % 2:
        for d in hdivs:                        # prefer an even step count
            if (n_batch * (h_out // d)) % 2 == 0 and 2 * d >= th:
                th = d
                break
    return 1, th


# ------------------------------- public wrapper ---------------------------- #

def block_forward(x_nchw, w1, b1, w2, b2, *, vmem_budget_bytes=None):
    """Pallas equivalent of Block.forward.

    x_nchw : (N, Cin, H, W)     float32
    w1     : (Cout, Cin, 3, 3)  PyTorch OIHW
    b1     : (Cout,)
    w2     : (Cout, Cout, 3, 3)
    b2     : (Cout,)
    returns: (N, Cout, H-4, W-4) float32 (NCHW, matching PyTorch)
    """
    N, Cin, H, W = x_nchw.shape
    Cout = w1.shape[0]
    assert H >= 5 and W >= 5, "two valid 3x3 convs need H, W >= 5"
    H2, W2 = H - 4, W - 4

    # Lane-dense output channels; pad conv1's output channels too when Cout is
    # big enough that lane-sparse h1 / conv2 patches would cost relayouts.
    Cp = _round_up(Cout, 128)
    C1 = _round_up(Cout, 128) if Cout >= 64 else Cout

    # ---- glue in plain JAX: layout/dtype transforms hoisted out of kernel ----
    x = jnp.transpose(x_nchw, (0, 2, 3, 1)).astype(jnp.bfloat16)  # NHWC, bf16
    w1_t = jnp.transpose(w1, (2, 3, 1, 0))                        # (3,3,Cin,Cout)
    w1_m = jnp.pad(w1_t, ((0, 0), (0, 0), (0, 0), (0, C1 - Cout)))
    w1_m = w1_m.reshape(9 * Cin, C1).astype(jnp.bfloat16)
    w2_t = jnp.transpose(w2, (2, 3, 1, 0))                        # (3,3,Cout,Cout)
    w2_m = jnp.pad(w2_t, ((0, 0), (0, 0), (0, C1 - Cout), (0, Cp - Cout)))
    w2_m = w2_m.reshape(9 * C1, Cp).astype(jnp.bfloat16)
    b1_2d = jnp.pad(b1, (0, C1 - Cout)).reshape(1, C1).astype(jnp.float32)
    b2_2d = jnp.pad(b2, (0, Cp - Cout)).reshape(1, Cp).astype(jnp.float32)

    # ---- generation-aware VMEM budget + intermediate-aware tile selection ----
    try:
        vmem_cap = int(pltpu.get_tpu_info().vmem_capacity_bytes)
    except Exception:
        vmem_cap = 64 << 20            # conservative (v7x per-TensorCore VMEM)
    w_resident = 2 * ((9 * Cin * C1 + 9 * C1 * Cp) * 2 + (C1 + Cp) * 4)
    budget = (vmem_cap * 3) // 4 - w_resident      # ~48 MiB v7x / ~96 MiB v5e,v6e
    if vmem_budget_bytes is not None:
        budget = int(vmem_budget_bytes)
    tile_bytes = lambda nb, th: _tile_vmem_bytes(nb, th, W, Cin, C1, Cp)
    NB, TH = _pick_tiles(N, H2, budget, tile_bytes)

    est = tile_bytes(NB, TH) + w_resident
    vmem_limit = int(min(max(2 * est, 32 << 20), (vmem_cap * 7) // 8))

    n_b = N // NB
    n_h = H2 // TH
    out_shape = jax.ShapeDtypeStruct((N, H2, W2, Cp), jnp.float32)

    # Constant (grid-invariant) operands: resident across grid steps.
    w_specs = [
        pl.BlockSpec((9 * Cin, C1), lambda *_: (0, 0)),
        pl.BlockSpec((1, C1), lambda *_: (0, 0)),
        pl.BlockSpec((9 * C1, Cp), lambda *_: (0, 0)),
        pl.BlockSpec((1, Cp), lambda *_: (0, 0)),
    ]

    if n_h == 1:
        # Whole-image tiles: everything auto-pipelined by BlockSpecs.
        out_nhwc = pl.pallas_call(
            _block_kernel,
            out_shape=out_shape,
            grid_spec=pltpu.PrefetchScalarGridSpec(
                num_scalar_prefetch=0,
                grid=(n_b,),
                in_specs=[pl.BlockSpec((NB, H, W, Cin),
                                       lambda i: (i, 0, 0, 0))] + w_specs,
                out_specs=pl.BlockSpec((NB, H2, W2, Cp),
                                       lambda i: (i, 0, 0, 0)),
            ),
            compiler_params=pltpu.CompilerParams(
                dimension_semantics=("parallel",),
                vmem_limit_bytes=vmem_limit,
            ),
        )(x, w1_m, b1_2d, w2_m, b2_2d)
    else:
        # Halo row tiling: input stays in HBM; each step DMAs a (TH+4)-row
        # window manually (start+wait -> no cross-step state -> "parallel" ok).
        out_nhwc = pl.pallas_call(
            _block_kernel_halo,
            out_shape=out_shape,
            grid_spec=pltpu.PrefetchScalarGridSpec(
                num_scalar_prefetch=0,
                grid=(n_b, n_h),
                in_specs=[pl.BlockSpec(memory_space=pl.ANY)] + w_specs,
                out_specs=pl.BlockSpec((NB, TH, W2, Cp),
                                       lambda b, h: (b, h, 0, 0)),
                scratch_shapes=[
                    pltpu.VMEM((NB, TH + 4, W, Cin), jnp.bfloat16),
                    pltpu.SemaphoreType.DMA,
                ],
            ),
            compiler_params=pltpu.CompilerParams(
                dimension_semantics=("parallel", "parallel"),
                vmem_limit_bytes=vmem_limit,
            ),
        )(x, w1_m, b1_2d, w2_m, b2_2d)

    # Drop channel padding, NHWC -> NCHW to match the PyTorch convention.
    # (For chained blocks, keep NHWC + padding end-to-end instead.)
    return jnp.transpose(out_nhwc[..., :Cout], (0, 3, 1, 2))


# --------------------------------- reference -------------------------------- #

def _reference(x_nchw, w1, b1, w2, b2):
    """f32 lax.conv reference with the kernel's bf16 input/weight/activation
    rounding, so the comparison isolates kernel correctness from quantization."""
    f32 = jnp.float32
    bf = lambda a: a.astype(jnp.bfloat16).astype(f32)
    hi = jax.lax.Precision.HIGHEST
    dn = jax.lax.conv_dimension_numbers(x_nchw.shape, w1.shape,
                                        ("NCHW", "OIHW", "NCHW"))
    h = jax.lax.conv_general_dilated(bf(x_nchw), bf(w1), (1, 1), "VALID",
                                     dimension_numbers=dn, precision=hi)
    h = jax.nn.relu(h + b1.reshape(1, -1, 1, 1).astype(f32))
    h = bf(h)                               # kernel feeds conv2 bf16 activations
    o = jax.lax.conv_general_dilated(h, bf(w2), (1, 1), "VALID",
                                     dimension_numbers=dn, precision=hi)
    return jax.nn.relu(o + b2.reshape(1, -1, 1, 1).astype(f32))


if __name__ == "__main__":
    root = jax.random.PRNGKey(0)

    def make_case(key, N, Cin, Cout, H, W, scale):
        ks = jax.random.split(key, 5)
        x = jax.random.normal(ks[0], (N, Cin, H, W), jnp.float32)
        w1 = jax.random.normal(ks[1], (Cout, Cin, 3, 3), jnp.float32) * scale
        b1 = jax.random.normal(ks[2], (Cout,), jnp.float32) * 0.1
        w2 = jax.random.normal(ks[3], (Cout, Cout, 3, 3), jnp.float32) * scale
        b2 = jax.random.normal(ks[4], (Cout,), jnp.float32) * 0.1
        return x, w1, b1, w2, b2

    cases = [
        # (shape kwargs, forced VMEM budget) -- budget=None uses the real
        # hardware budget (pure BlockSpec path); the tiny budget in the last
        # case forces the halo row-tiled manual-DMA path.
        (dict(N=2, Cin=4, Cout=8, H=16, W=16, scale=0.2), None),
        (dict(N=1, Cin=128, Cout=128, H=12, W=12, scale=0.1), None),  # per-tap
        (dict(N=1, Cin=4, Cout=8, H=36, W=36, scale=0.2), 1 << 20),   # halo
    ]
    keys = jax.random.split(root, len(cases))
    for (cfg, budget), k in zip(cases, keys):
        x, w1, b1, w2, b2 = make_case(k, **cfg)
        out = jax.block_until_ready(
            block_forward(x, w1, b1, w2, b2, vmem_budget_bytes=budget))
        ref = _reference(x, w1, b1, w2, b2)
        assert out.shape == ref.shape, (cfg, out.shape, ref.shape)
        max_err = float(jnp.max(jnp.abs(out - ref)))
        assert jnp.allclose(out, ref, atol=5e-2, rtol=5e-2), (
            f"mismatch vs reference for {cfg}: max abs err = {max_err}")
    print("KERNEL_OK")
</pallas_src>

<mosaic_0001>
module attributes {stable_mosaic.version = 11 : i64} {
  func.func @_block_kernel(%arg0: i32, %arg1: memref<1x16x16x4xbf16, #tpu.memory_space<vmem>>, %arg2: memref<36x8xbf16, #tpu.memory_space<vmem>>, %arg3: memref<1x8xf32, #tpu.memory_space<vmem>>, %arg4: memref<72x128xbf16, #tpu.memory_space<vmem>>, %arg5: memref<1x128xf32, #tpu.memory_space<vmem>>, %arg6: memref<1x12x12x128xf32, #tpu.memory_space<vmem>>) attributes {dimension_semantics = [#tpu.dimension_semantics<parallel>], iteration_bounds = array<i64: 2>, scalar_prefetch = 0 : i64, scratch_operands = 0 : i64, tpu.core_type = #tpu.core_type<tc>, window_params = [{transform_indices = @transform_0, window_bounds = array<i64: 1, 16, 16, 4>}, {pipeline_mode = #tpu.pipeline_mode<synchronous>, transform_indices = @transform_1, window_bounds = array<i64: 36, 8>}, {pipeline_mode = #tpu.pipeline_mode<synchronous>, transform_indices = @transform_2, window_bounds = array<i64: 1, 8>}, {pipeline_mode = #tpu.pipeline_mode<synchronous>, transform_indices = @transform_3, window_bounds = array<i64: 72, 128>}, {pipeline_mode = #tpu.pipeline_mode<synchronous>, transform_indices = @transform_4, window_bounds = array<i64: 1, 128>}, {transform_indices = @transform_5, window_bounds = array<i64: 1, 12, 12, 128>}]} {
    %c0 = arith.constant 0 : index
    %c0_0 = arith.constant 0 : index
    %c0_1 = arith.constant 0 : index
    %c0_2 = arith.constant 0 : index
    %0 = vector.load %arg1[%c0, %c0_0, %c0_1, %c0_2] : memref<1x16x16x4xbf16, #tpu.memory_space<vmem>>, vector<1x16x16x4xbf16>
    %1 = vector.extract_strided_slice %0 {offsets = [0, 0, 0, 0], sizes = [1, 14, 14, 4], strides = [1, 1, 1, 1]} : vector<1x16x16x4xbf16> to vector<1x14x14x4xbf16>
    %2 = vector.extract_strided_slice %0 {offsets = [0, 0, 1, 0], sizes = [1, 14, 14, 4], strides = [1, 1, 1, 1]} : vector<1x16x16x4xbf16> to vector<1x14x14x4xbf16>
    %3 = vector.extract_strided_slice %0 {offsets = [0, 0, 2, 0], sizes = [1, 14, 14, 4], strides = [1, 1, 1, 1]} : vector<1x16x16x4xbf16> to vector<1x14x14x4xbf16>
    %4 = vector.extract_strided_slice %0 {offsets = [0, 1, 0, 0], sizes = [1, 14, 14, 4], strides = [1, 1, 1, 1]} : vector<1x16x16x4xbf16> to vector<1x14x14x4xbf16>
    %5 = vector.extract_strided_slice %0 {offsets = [0, 1, 1, 0], sizes = [1, 14, 14, 4], strides = [1, 1, 1, 1]} : vector<1x16x16x4xbf16> to vector<1x14x14x4xbf16>
    %6 = vector.extract_strided_slice %0 {offsets = [0, 1, 2, 0], sizes = [1, 14, 14, 4], strides = [1, 1, 1, 1]} : vector<1x16x16x4xbf16> to vector<1x14x14x4xbf16>
    %7 = vector.extract_strided_slice %0 {offsets = [0, 2, 0, 0], sizes = [1, 14, 14, 4], strides = [1, 1, 1, 1]} : vector<1x16x16x4xbf16> to vector<1x14x14x4xbf16>
    %8 = vector.extract_strided_slice %0 {offsets = [0, 2, 1, 0], sizes = [1, 14, 14, 4], strides = [1, 1, 1, 1]} : vector<1x16x16x4xbf16> to vector<1x14x14x4xbf16>
    %9 = vector.extract_strided_slice %0 {offsets = [0, 2, 2, 0], sizes = [1, 14, 14, 4], strides = [1, 1, 1, 1]} : vector<1x16x16x4xbf16> to vector<1x14x14x4xbf16>
    %10 = tpu.concatenate %1, %2, %3, %4, %5, %6, %7, %8, %9 in 3 : vector<1x14x14x4xbf16>, vector<1x14x14x4xbf16>, vector<1x14x14x4xbf16>, vector<1x14x14x4xbf16>, vector<1x14x14x4xbf16>, vector<1x14x14x4xbf16>, vector<1x14x14x4xbf16>, vector<1x14x14x4xbf16>, vector<1x14x14x4xbf16> -> vector<1x14x14x36xbf16>
    %11 = vector.shape_cast %10 : vector<1x14x14x36xbf16> to vector<196x36xbf16>
    %c0_3 = arith.constant 0 : index
    %c0_4 = arith.constant 0 : index
    %12 = vector.load %arg2[%c0_3, %c0_4] : memref<36x8xbf16, #tpu.memory_space<vmem>>, vector<36x8xbf16>
    %cst = arith.constant dense<0.000000e+00> : vector<196x8xf32>
    %13 = tpu.matmul %11, %12, %cst {dimension_numbers = #tpu.dot_dimension_numbers<[1], [0], [0], [1], [0, 0, 1, 1], [], []>} : vector<196x36xbf16>, vector<36x8xbf16>, vector<196x8xf32> -> vector<196x8xf32>
    %c0_5 = arith.constant 0 : index
    %c0_6 = arith.constant 0 : index
    %14 = vector.load %arg3[%c0_5, %c0_6] : memref<1x8xf32, #tpu.memory_space<vmem>>, vector<1x8xf32>
    %15 = vector.broadcast %14 : vector<1x8xf32> to vector<196x8xf32>
    %16 = arith.addf %13, %15 : vector<196x8xf32>
    %cst_7 = arith.constant 0.000000e+00 : f32
    %17 = vector.broadcast %cst_7 : f32 to vector<196x8xf32>
    %18 = arith.maximumf %16, %17 : vector<196x8xf32>
    %19 = vector.shape_cast %18 : vector<196x8xf32> to vector<1x14x14x8xf32>
    %20 = arith.truncf %19 : vector<1x14x14x8xf32> to vector<1x14x14x8xbf16>
    %21 = vector.extract_strided_slice %20 {offsets = [0, 0, 0, 0], sizes = [1, 12, 12, 8], strides = [1, 1, 1, 1]} : vector<1x14x14x8xbf16> to vector<1x12x12x8xbf16>
    %22 = vector.extract_strided_slice %20 {offsets = [0, 0, 1, 0], sizes = [1, 12, 12, 8], strides = [1, 1, 1, 1]} : vector<1x14x14x8xbf16> to vector<1x12x12x8xbf16>
    %23 = vector.extract_strided_slice %20 {offsets = [0, 0, 2, 0], sizes = [1, 12, 12, 8], strides = [1, 1, 1, 1]} : vector<1x14x14x8xbf16> to vector<1x12x12x8xbf16>
    %24 = vector.extract_strided_slice %20 {offsets = [0, 1, 0, 0], sizes = [1, 12, 12, 8], strides = [1, 1, 1, 1]} : vector<1x14x14x8xbf16> to vector<1x12x12x8xbf16>
    %25 = vector.extract_strided_slice %20 {offsets = [0, 1, 1, 0], sizes = [1, 12, 12, 8], strides = [1, 1, 1, 1]} : vector<1x14x14x8xbf16> to vector<1x12x12x8xbf16>
    %26 = vector.extract_strided_slice %20 {offsets = [0, 1, 2, 0], sizes = [1, 12, 12, 8], strides = [1, 1, 1, 1]} : vector<1x14x14x8xbf16> to vector<1x12x12x8xbf16>
    %27 = vector.extract_strided_slice %20 {offsets = [0, 2, 0, 0], sizes = [1, 12, 12, 8], strides = [1, 1, 1, 1]} : vector<1x14x14x8xbf16> to vector<1x12x12x8xbf16>
    %28 = vector.extract_strided_slice %20 {offsets = [0, 2, 1, 0], sizes = [1, 12, 12, 8], strides = [1, 1, 1, 1]} : vector<1x14x14x8xbf16> to vector<1x12x12x8xbf16>
    %29 = vector.extract_strided_slice %20 {offsets = [0, 2, 2, 0], sizes = [1, 12, 12, 8], strides = [1, 1, 1, 1]} : vector<1x14x14x8xbf16> to vector<1x12x12x8xbf16>
    %30 = tpu.concatenate %21, %22, %23, %24, %25, %26, %27, %28, %29 in 3 : vector<1x12x12x8xbf16>, vector<1x12x12x8xbf16>, vector<1x12x12x8xbf16>, vector<1x12x12x8xbf16>, vector<1x12x12x8xbf16>, vector<1x12x12x8xbf16>, vector<1x12x12x8xbf16>, vector<1x12x12x8xbf16>, vector<1x12x12x8xbf16> -> vector<1x12x12x72xbf16>
    %31 = vector.shape_cast %30 : vector<1x12x12x72xbf16> to vector<144x72xbf16>
    %c0_8 = arith.constant 0 : index
    %c0_9 = arith.constant 0 : index
    %32 = vector.load %arg4[%c0_8, %c0_9] : memref<72x128xbf16, #tpu.memory_space<vmem>>, vector<72x128xbf16>
    %cst_10 = arith.constant dense<0.000000e+00> : vector<144x128xf32>
    %33 = tpu.matmul %31, %32, %cst_10 {dimension_numbers = #tpu.dot_dimension_numbers<[1], [0], [0], [1], [0, 0, 1, 1], [], []>} : vector<144x72xbf16>, vector<72x128xbf16>, vector<144x128xf32> -> vector<144x128xf32>
    %c0_11 = arith.constant 0 : index
    %c0_12 = arith.constant 0 : index
    %34 = vector.load %arg5[%c0_11, %c0_12] : memref<1x128xf32, #tpu.memory_space<vmem>>, vector<1x128xf32>
    %35 = vector.broadcast %34 : vector<1x128xf32> to vector<144x128xf32>
    %36 = arith.addf %33, %35 : vector<144x128xf32>
    %cst_13 = arith.constant 0.000000e+00 : f32
    %37 = vector.broadcast %cst_13 : f32 to vector<144x128xf32>
    %38 = arith.maximumf %36, %37 : vector<144x128xf32>
    %39 = vector.shape_cast %38 : vector<144x128xf32> to vector<1x12x12x128xf32>
    %c0_14 = arith.constant 0 : index
    %c0_15 = arith.constant 0 : index
    %c0_16 = arith.constant 0 : index
    %c0_17 = arith.constant 0 : index
    %40 = vector.load %arg6[%c0_14, %c0_15, %c0_16, %c0_17] : memref<1x12x12x128xf32, #tpu.memory_space<vmem>>, vector<1x12x12x128xf32>
    tpu.vector_store %arg6[%c0_14, %c0_15, %c0_16, %c0_17], %39 {strides = array<i32>} : memref<1x12x12x128xf32, #tpu.memory_space<vmem>>, vector<1x12x12x128xf32>,
    return
  }
  func.func @transform_0(%arg0: i32) -> (i32, i32, i32, i32) {
    %c0_i32 = arith.constant 0 : i32
    %c0_i32_0 = arith.constant 0 : i32
    %c0_i32_1 = arith.constant 0 : i32
    %c0_i32_2 = arith.constant 0 : i32
    return %arg0, %c0_i32, %c0_i32_0, %c0_i32_1 : i32, i32, i32, i32
  }
  func.func @transform_1(%arg0: i32) -> (i32, i32) {
    %c0_i32 = arith.constant 0 : i32
    %c0_i32_0 = arith.constant 0 : i32
    %c0_i32_1 = arith.constant 0 : i32
    return %c0_i32, %c0_i32_0 : i32, i32
  }
  func.func @transform_2(%arg0: i32) -> (i32, i32) {
    %c0_i32 = arith.constant 0 : i32
    %c0_i32_0 = arith.constant 0 : i32
    %c0_i32_1 = arith.constant 0 : i32
    return %c0_i32, %c0_i32_0 : i32, i32
  }
  func.func @transform_3(%arg0: i32) -> (i32, i32) {
    %c0_i32 = arith.constant 0 : i32
    %c0_i32_0 = arith.constant 0 : i32
    %c0_i32_1 = arith.constant 0 : i32
    return %c0_i32, %c0_i32_0 : i32, i32
  }
  func.func @transform_4(%arg0: i32) -> (i32, i32) {
    %c0_i32 = arith.constant 0 : i32
    %c0_i32_0 = arith.constant 0 : i32
    %c0_i32_1 = arith.constant 0 : i32
    return %c0_i32, %c0_i32_0 : i32, i32
  }
  func.func @transform_5(%arg0: i32) -> (i32, i32, i32, i32) {
    %c0_i32 = arith.constant 0 : i32
    %c0_i32_0 = arith.constant 0 : i32
    %c0_i32_1 = arith.constant 0 : i32
    %c0_i32_2 = arith.constant 0 : i32
    return %arg0, %c0_i32, %c0_i32_0, %c0_i32_1 : i32, i32, i32, i32
  }
}

</mosaic_0001>

<bundles_post_ra>
// kernel: tpu_custom_call.1
= control target key start
LH: loop header
LB: loop body
LE: loop exit
PB: predicated region body
PF: predicated region fallthrough
CT: control target
= control target key end

     0   :  { %s4906_s18 = smov 0   ;;  %s6154_s0 = inlined_call_operand.vmem [shape: bf16[2,16,16,4], index: 0, kind: input, shape index: {}]   ;;  %s6155_s1 = inlined_call_operand.vmem [shape: bf16[36,8], index: 1, kind: input, shape index: {}]   ;;  %s6156_s2 = inlined_call_operand.vmem [shape: f32[1,8], index: 2, kind: input, shape index: {}]   ;;  %s6157_s3 = inlined_call_operand.vmem [shape: bf16[72,128], index: 3, kind: input, shape index: {}]   ;;  %s6158_s4 = inlined_call_operand.vmem [shape: f32[1,128], index: 4, kind: input, shape index: {}]   ;;  %s6159_s5 = inlined_call_operand.vmem [shape: f32[2,12,12,128], index: 5, kind: output, shape index: {}]  }
   0x1 LB: > { %s4602_s19 = sadd.s32 4294967295, %s4858_s18   ;;  %p4606_p0 = scmp.ge.s32.totalorder %s4858_s18, 1  ;;  %s4858_s18 = sphi %s4906_s18, %s15_s18  }
   0x2   : > { %p187_p1 = scmp.lt.s32.totalorder %s4858_s18, 3 }
   0x4   : > { %p188_p2 = pnand %p4606_p0, %p187_p1 }
   0x5   : > { %p215_p3 = scmp.lt.s32.totalorder (!%p188_p2), %s4602_s19, 1  ;;  %s4860_s24 = smov (!%p188_p2), 12   ;;  %v4838_v22 = vld [vmem:[%s6155_s1] sm:$0xff] (!%p188_p2)   ;;  %v4868_v23 = vmov (!%p188_p2), 0.0   ;;  %v4840_v25 = vld [vmem:[%s6155_s1 + $0x8] sm:$0xff] (!%p188_p2)   ;;  %vm2278_vm0 = vcmask (!%p188_p2), 1041408  }
   0x6   : > { %191 = sbr.rel (%p188_p2) target bundleno = 966 (0x3c6), region = 40  ;;  %s4861_s25 = smov (!%p188_p2), 8   ;;  %4698 = vmatprep.subr.bf16.mxu0 (!%p188_p2), %v4868_v23  ;;  %4756 = vmatprep.subr.bf16.mxu1 (!%p188_p2), %v4868_v23  ;;  %v4841_v27 = vld [vmem:[%s6155_s1 + $0x10] ss:$0 sps:$4 sm:$0x33] (!%p188_p2)   ;;  %vm4869_vm1 = vmmov (!%p188_p2), 0  }
   0x7   : > { %s4862_s26 = smov (!%p188_p2), 24   ;;  %s4863_s27 = smov (!%p188_p2), 20   ;;  %4699 = vmatpush3.bf16.msra.mxu0 (!%p188_p2), %v4838_v22  ;;  %v2280_v29 = vsel (!%p188_p2), %vm2278_vm0, %v4841_v27, 0  ;;  %4704 = vmatprep.mubr.msk.bf16.mxu0 (!%p188_p2), %vm4869_vm1, %v4868_v23  ;;  %vm690_vm2 = vcmask (!%p188_p2), 31744   ;;  %vm719_vm3 = vcmask (!%p188_p2), 64512   ;;  %vm748_vm4 = vcmask (!%p188_p2), 97280  }
   0x8   : > { %s4864_s28 = smov (!%p188_p2), 4   ;;  %s4865_s29 = smov (!%p188_p2), 16   ;;  %4700 = vmatprep.subr.bf16.mxu0 (!%p188_p2), %v4868_v23  ;;  %4766 = vmatprep.mubr.msk.bf16.mxu1 (!%p188_p2), %vm4869_vm1, %v4868_v23  ;;  %vm777_vm5 = vcmask (!%p188_p2), 130048   ;;  %vm806_vm6 = vcmask (!%p188_p2), 162816   ;;  %vm835_vm7 = vcmask (!%p188_p2), 195584   ;;  %vm864_vm8 = vcmask (!%p188_p2), 228352  }
   0x9   : > { %s4866_s30 = smov (!%p188_p2), 28   ;;  %s4867_s6 = smov (!%p188_p2), 32   ;;  %vm893_vm9 = vcmask (!%p188_p2), 261120   ;;  %vm2238_vm10 = vcmask (!%p188_p2), 293888   ;;  %vm4330_vm11 = vcmask (!%p188_p2), 1043456   ;;  %vm3802_vm12 = vcmask (!%p188_p2), 326656  }
   0xa   : > { %s4872_s15 = smov (!%p188_p2), 40   ;;  %s4873_s16 = smov (!%p188_p2), 48   ;;  %vm3827_vm13 = vcmask (!%p188_p2), 392192   ;;  %vm3852_vm14 = vcmask (!%p188_p2), 457728   ;;  %vm3877_vm15 = vcmask (!%p188_p2), 523264   ;;  %vm4302_vm0 = vcmask (!%p188_p2), 588800  }
   0xb   : > { %4701 = vmatpush3.bf16.msra.mxu0 (!%p188_p2), %v4840_v25  ;;  %s4874_s21 = smov (!%p188_p2), 64  }
   0xc   : > { %4702 = vmatprep.subr.bf16.mxu0 (!%p188_p2), %v4868_v23 }
   0xd   : > { %s6161_s19 = smov (!%p215_p3, %s4602_s19), 1 }
   0xe   : > { %s4667_s20 = sshll.u32 %s6161_s19, 7 }
   0xf   : > { %s4920_s23 = scalar_lea.vmem %s6154_s0, %s4667_s20  ;;  %4703 = vmatpush3.bf16.msra.mxu0 %v2280_v29 }
  0x10   : > { %v4923_v0 = vld [vmem:[%s4920_s23 + $0x8] sm:$0xff]   ;;  %v4926_v1 = vld [vmem:[%s4920_s23] sm:$0xff]   ;;  %v4931_v2 = vld [vmem:[%s4920_s23 + $0x10] sm:$0xff]  }
  0x11   : > { %501 = vrot.lane.b32.xlu1 %v4923_v0, %s4860_s24  ;;  %v454_v3 = vrot.slane %v4926_v1, 1  ;;  %v331_v4 = vshll.u32 %v4926_v1, 16  ;;  %v455_v5 = vrot.slane %v4923_v0, 1  ;;  %v338_v6 = vshll.u32 %v4923_v0, 16  ;;  %v4948_v16 = vld [vmem:[%s4920_s23 + $0x18] sm:$0xff]   ;;  %v4980_v28 = vld [vmem:[%s4920_s23 + $0x20] sm:$0xff]  }
  0x12   : > { %v329_v7 = vshrl.u32 %v4926_v1, 16  ;;  %v336_v9 = vshrl.u32 %v4923_v0, 16  ;;  %v345_v11 = vshll.u32 %v4931_v2, 16  ;;  %v343_v14 = vshrl.u32 %v4931_v2, 16  ;;  %v5000_v35 = vld [vmem:[%s4920_s23 + $0x28] sm:$0xff]   ;;  %v5015_v41 = vld [vmem:[%s4920_s23 + $0x30] sm:$0xff]  }
  0x13   : > { %468 = vrot.lane.b32.xlu0 %v454_v3, %s4861_s25  ;;  %v333_v8 = vrot.slane %v331_v4, 1  ;;  %v340_v10 = vrot.slane %v338_v6, 1  ;;  %v352_v18 = vshll.u32 %v4948_v16, 16  ;;  %v456_v19 = vrot.slane %v4931_v2, 1  ;;  %v5032_v47 = vld [vmem:[%s4920_s23 + $0x38] sm:$0xff]   ;;  %v5048_v53 = vld [vmem:[%s4920_s23 + $0x40] sm:$0xff]  }
  0x14   : > { %v347_v15 = vrot.slane %v345_v11, 1  ;;  %v350_v20 = vshrl.u32 %v4948_v16, 16  ;;  %v457_v26 = vrot.slane %v4948_v16, 1  ;;  %v359_v30 = vshll.u32 %v4980_v28, 16  ;;  %v5064_v59 = vld [vmem:[%s4920_s23 + $0x48] sm:$0xff]  }
  0x15   : > { %598 = vrot.lane.b32.xlu1 %v4931_v2, %s4862_s26  ;;  %v334_v12 = vor.u32 %v333_v8, %v329_v7  ;;  %v341_v13 = vor.u32 %v340_v10, %v336_v9  ;;  %v354_v21 = vrot.slane %v352_v18, 1  ;;  %v357_v31 = vshrl.u32 %v4980_v28, 16 }
  0x16   : > { %v348_v17 = vor.u32 %v347_v15, %v343_v14  ;;  %v361_v32 = vrot.slane %v359_v30, 1  ;;  %v458_v33 = vrot.slane %v4980_v28, 1  ;;  %v366_v36 = vshll.u32 %v5000_v35, 16 }
  0x17   : > { %470 = vrot.lane.b32.xlu0 %v455_v5, %s4861_s25  ;;  %v355_v24 = vor.u32 %v354_v21, %v350_v20  ;;  %v364_v37 = vshrl.u32 %v5000_v35, 16  ;;  %v459_v39 = vrot.slane %v5000_v35, 1  ;;  %v373_v42 = vshll.u32 %v5015_v41, 16  ;;  %v5090_v20 = vld [vmem:[%s4920_s23 + $0x50] sm:$0xff]  }
  0x18   : > { %v362_v34 = vor.u32 %v361_v32, %v357_v31  ;;  %v368_v38 = vrot.slane %v366_v36, 1  ;;  %v371_v43 = vshrl.u32 %v5015_v41, 16  ;;  %v460_v46 = vrot.slane %v5015_v41, 1 }
  0x19   : > { %565 = vrot.lane.b32.xlu1 %v455_v5, %s4863_s27  ;;  %v375_v44 = vrot.slane %v373_v42, 1  ;;  %v380_v48 = vshll.u32 %v5032_v47, 16  ;;  %v378_v49 = vshrl.u32 %v5032_v47, 16  ;;  %v461_v51 = vrot.slane %v5032_v47, 1 }
  0x1a   : > { %v369_v40 = vor.u32 %v368_v38, %v364_v37  ;;  %v387_v54 = vshll.u32 %v5048_v53, 16  ;;  %v385_v55 = vshrl.u32 %v5048_v53, 16  ;;  %v462_v57 = vrot.slane %v5048_v53, 1 }
  0x1b   : > { %426 = vrot.lane.b32.xlu0 %v334_v12, %s4864_s28  ;;  %v376_v45 = vor.u32 %v375_v44, %v371_v43  ;;  %v382_v50 = vrot.slane %v380_v48, 1  ;;  %v394_v61 = vshll.u32 %v5064_v59, 16  ;;  %v392_v3 = vshrl.u32 %v5064_v59, 16 }
  0x1c   : > { %v389_v56 = vrot.slane %v387_v54, 1  ;;  %v5076_v5 = vrot.slane %v5064_v59, 1  ;;  %v4870_v9 = vmov 1966171168   ;;  %v940_v11 = vlaneseq }
  0x1d   : > { %536 = vrot.lane.b32.xlu1 %v341_v13, %s4865_s29  ;;  %v383_v52 = vor.u32 %v382_v50, %v378_v49  ;;  %v396_v4 = vrot.slane %v394_v61, 1  ;;  %v938_v10 = vunpack.c.l.s4 %v4870_v9  ;;  %v401_v27 = vshll.u32 %v5090_v20, 16 }
  0x1e   : > { %v390_v58 = vor.u32 %v389_v56, %v385_v55  ;;  %v5128_v56 = vrot.slane %v5090_v20, 1 }
  0x1f   : > { %428 = vrot.lane.b32.xlu0 %v341_v13, %s4864_s28  ;;  %v397_v8 = vor.u32 %v396_v4, %v392_v3  ;;  %v939_v18 = vunpack.c.0.s8 %v938_v10  ;;  %v403_v38 = vrot.slane %v401_v27, 1 }
  0x21   : > { %633 = vrot.lane.b32.xlu1 %v348_v17, %s4866_s30 }
  0x23   : > { %503 = vrot.lane.b32.xlu0 %v4931_v2, %s4860_s24 }
  0x25   : > { %662 = vrot.lane.b32.xlu1 %v456_v19, %s4867_s6 }
  0x27   : > { %538 = vrot.lane.b32.xlu0 %v348_v17, %s4865_s29 }
  0x29   : > { %600 = vrot.lane.b32.xlu1 %v4948_v16, %s4862_s26 }
  0x2b   : > { %567 = vrot.lane.b32.xlu0 %v456_v19, %s4863_s27 }
  0x2d   : > { %635 = vrot.lane.b32.xlu1 %v355_v24, %s4866_s30 }
  0x2f   : > { %430 = vrot.lane.b32.xlu0 %v348_v17, %s4864_s28 }
  0x31   : > { %664 = vrot.lane.b32.xlu1 %v457_v26, %s4867_s6 }
  0x33   : > { %472 = vrot.lane.b32.xlu0 %v456_v19, %s4861_s25  ;;  %v5087_v19 = vshrl.u32 %v940_v11, 7 }
  0x35   : > { %540 = vrot.lane.b32.xlu1 %v355_v24, %s4865_s29 }
  0x37   : > { %505 = vrot.lane.b32.xlu0 %v4948_v16, %s4860_s24 }
  0x39   : > { %602 = vrot.lane.b32.xlu1 %v4980_v28, %s4862_s26 }
  0x3b   : > { %569 = vrot.lane.b32.xlu0 %v457_v26, %s4863_s27 }
  0x3d   : > { %666 = vrot.lane.b32.xlu1 %v458_v33, %s4867_s6 }
  0x3f   : > { %637 = vrot.lane.b32.xlu0 %v362_v34, %s4866_s30 }
  0x41   : > { %474 = vrot.lane.b32.xlu1 %v457_v26, %s4861_s25  ;;  %v5098_v26 = vsub.s32 %v939_v18, %v5087_v19 }
  0x43   : > { %432 = vrot.lane.b32.xlu0 %v355_v24, %s4864_s28 }
  0x45   : > { %542 = vrot.lane.b32.xlu1 %v362_v34, %s4865_s29 }
  0x47   : > { %507 = vrot.lane.b32.xlu0 %v4980_v28, %s4860_s24 }
  0x49   : > { %604 = vrot.lane.b32.xlu1 %v5000_v35, %s4862_s26 }
  0x4b   : > { %571 = vrot.lane.b32.xlu0 %v458_v33, %s4863_s27 }
  0x4d   : > { %668 = vrot.lane.b32.xlu1 %v459_v39, %s4867_s6 }
  0x4f   : > { %639 = vrot.lane.b32.xlu0 %v369_v40, %s4866_s30 }
  0x51   : > { %476 = vrot.lane.b32.xlu1 %v458_v33, %s4861_s25  ;;  %v399_v33 = vshrl.u32 %v5090_v20, 16 }
  0x53   : > { %434 = vrot.lane.b32.xlu0 %v362_v34, %s4864_s28 }
  0x55   : > { %544 = vrot.lane.b32.xlu1 %v369_v40, %s4865_s29 }
  0x57   : > { %509 = vrot.lane.b32.xlu0 %v5000_v35, %s4860_s24 }
  0x59   : > { %606 = vrot.lane.b32.xlu1 %v5015_v41, %s4862_s26 }
  0x5b   : > { %573 = vrot.lane.b32.xlu0 %v459_v39, %s4863_s27 }
  0x5d   : > { %641 = vrot.lane.b32.xlu1 %v376_v45, %s4866_s30 }
  0x5f   : > { %436 = vrot.lane.b32.xlu0 %v369_v40, %s4864_s28 }
  0x61   : > { %670 = vrot.lane.b32.xlu1 %v460_v46, %s4867_s6 }
  0x63   : > { %478 = vrot.lane.b32.xlu0 %v459_v39, %s4861_s25 }
  0x65   : > { %546 = vrot.lane.b32.xlu1 %v376_v45, %s4865_s29 }
  0x67   : > { %511 = vrot.lane.b32.xlu0 %v5015_v41, %s4860_s24 }
  0x69   : > { %608 = vrot.lane.b32.xlu1 %v5032_v47, %s4862_s26 }
  0x6b   : > { %575 = vrot.lane.b32.xlu0 %v460_v46, %s4863_s27 }
  0x6d   : > { %672 = vrot.lane.b32.xlu1 %v461_v51, %s4867_s6 }
  0x6f   : > { %643 = vrot.lane.b32.xlu0 %v383_v52, %s4866_s30 }
  0x71   : > { %480 = vrot.lane.b32.xlu1 %v460_v46, %s4861_s25  ;;  %v5118_v46 = vld [vmem:[%s4920_s23 + $0x58] sm:$0xff]  }
  0x73   : > { %438 = vrot.lane.b32.xlu0 %v376_v45, %s4864_s28 }
  0x75   : > { %548 = vrot.lane.b32.xlu1 %v383_v52, %s4865_s29 }
  0x77   : > { %513 = vrot.lane.b32.xlu0 %v5032_v47, %s4860_s24 }
  0x79   : > { %610 = vrot.lane.b32.xlu1 %v5048_v53, %s4862_s26 }
  0x7b   : > { %577 = vrot.lane.b32.xlu0 %v461_v51, %s4863_s27 }
  0x7d   : > { %674 = vrot.lane.b32.xlu1 %v462_v57, %s4867_s6 }
  0x7f   : > { %645 = vrot.lane.b32.xlu0 %v390_v58, %s4866_s30 }
  0x81   : > { %482 = vrot.lane.b32.xlu1 %v461_v51, %s4861_s25 }
  0x83   : > { %v502_v60 = vpop.permute.xlu1 %501  ;;  %440 = vrot.lane.b32.xlu0 %v383_v52, %s4864_s28 }
  0x85   : > { %550 = vrot.lane.b32.xlu1 %v390_v58, %s4865_s29  ;;  %v469_v62 = vpop.permute.xlu0 %468 }
  0x87   : > { %v599_v63 = vpop.permute.xlu1 %598  ;;  %515 = vrot.lane.b32.xlu0 %v5048_v53, %s4860_s24 }
  0x89   : > { %612 = vrot.lane.b32.xlu1 %v5064_v59, %s4862_s26  ;;  %v471_v6 = vpop.permute.xlu0 %470 }
  0x8b   : > { %v566_v7 = vpop.permute.xlu1 %565  ;;  %579 = vrot.lane.b32.xlu0 %v462_v57, %s4863_s27 }
  0x8d   : > { %676 = vrot.lane.b32.xlu1 %v5076_v5, %s4867_s6  ;;  %v427_v12 = vpop.permute.xlu0 %426 }
  0x8e   : > { %v692_v13 = vsel %vm690_vm2, %v4926_v1, %v427_v12 }
  0x8f   : > { %v537_v14 = vpop.permute.xlu1 %536  ;;  %v721_v15 = vsel %vm719_vm3, %v692_v13, %v469_v62  ;;  %647 = vrot.lane.b32.xlu0 %v397_v8, %s4866_s30 }
  0x90   : > { %v750_v17 = vsel %vm748_vm4, %v721_v15, %v502_v60 }
  0x91   : > { %484 = vrot.lane.b32.xlu1 %v462_v57, %s4861_s25  ;;  %v779_v21 = vsel %vm777_vm5, %v750_v17, %v537_v14  ;;  %v429_v1 = vpop.permute.xlu0 %428  ;;  %v408_v57 = vshll.u32 %v5118_v46, 16 }
  0x92   : > { %v808_v22 = vsel %vm806_vm6, %v779_v21, %v566_v7  ;;  %v694_v34 = vsel %vm690_vm2, %v4923_v0, %v429_v1  ;;  %v404_v0 = vor.u32 %v403_v38, %v399_v33 }
  0x93   : > { %v634_v24 = vpop.permute.xlu1 %633  ;;  %v837_v25 = vsel %vm835_vm7, %v808_v22, %v599_v63  ;;  %442 = vrot.lane.b32.xlu0 %v390_v58, %s4864_s28  ;;  %v723_v43 = vsel %vm719_vm3, %v694_v34, %v471_v6  ;;  %v410_v9 = vrot.slane %v408_v57, 1 }
  0x94   : > { %v866_v30 = vsel %vm864_vm8, %v837_v25, %v634_v24 }
  0x95   : > { %552 = vrot.lane.b32.xlu1 %v397_v8, %s4865_s29  ;;  %v504_v29 = vpop.permute.xlu0 %503 }
  0x96   : > { %v752_v45 = vsel %vm748_vm4, %v723_v43, %v504_v29 }
  0x97   : > { %v663_v31 = vpop.permute.xlu1 %662  ;;  %517 = vrot.lane.b32.xlu0 %v5064_v59, %s4860_s24 }
  0x98   : > { %v895_v32 = vsel %vm893_vm9, %v866_v30, %v663_v31 }
  0x99   : > { %v936_v36 = vcombine.high %v895_v32, %v895_v32  ;;  %v943_v37 = vrot.slane %v895_v32, %v5098_v26  ;;  %581 = vrot.lane.b32.xlu1 %v5076_v5, %s4863_s27  ;;  %v539_v39 = vpop.permute.xlu0 %538 }
  0x9a   : > { %v781_v48 = vsel %vm777_vm5, %v752_v45, %v539_v39 }
  0x9b   : > { %v950_v40 = vrot.slane %v936_v36, %v5098_v26  ;;  %v601_v42 = vpop.permute.xlu1 %600  ;;  %v951_v44 = vcombine.high %v943_v37, %v943_v37  ;;  %444 = vrot.lane.b32.xlu0 %v397_v8, %s4864_s28  ;;  %v959_v58 = vrot.slane %v943_v37, %v5098_v26  ;;  %v406_v8 = vshrl.u32 %v5118_v46, 16 }
  0x9c   : > { %v5163_v36 = vrot.slane %v5118_v46, 1 }
  0x9d   : > { %614 = vrot.lane.b32.xlu1 %v5090_v20, %s4862_s26  ;;  %v568_v49 = vpop.permute.xlu0 %567  ;;  %v952_v50 = vcombine.high %v950_v40, %v950_v40  ;;  %v973_v54 = vrot.slane %v951_v44, %v5098_v26  ;;  %v966_v3 = vrot.slane %v950_v40, %v5098_v26  ;;  %v5148_v1 = vor.u32 %v410_v9, %v406_v8 }
  0x9e   : > { %v810_v51 = vsel %vm806_vm6, %v781_v48, %v568_v49  ;;  %v5172_v49 = vld [vmem:[%s4920_s23 + $0x60] sm:$0xff]  }
  0x9f   : > { %v636_v52 = vpop.permute.xlu1 %635  ;;  %v839_v55 = vsel %vm835_vm7, %v810_v51, %v601_v42  ;;  %486 = vrot.lane.b32.xlu0 %v5076_v5, %s4861_s25  ;;  %v980_v61 = vrot.slane %v952_v50, %v5098_v26  ;;  %v1620_v4 = vcombine.low %v959_v58, %v973_v54  ;;  %v4627_v6 = vcombine.high %v959_v58, %v973_v54 }
  0xa0   : > { %v868_v62 = vsel %vm864_vm8, %v839_v55, %v636_v52  ;;  %v982_v17 = vcombine.high %v966_v3, %v966_v3 }
  0xa1   : > { %649 = vrot.lane.b32.xlu1 %v404_v0, %s4866_s30  ;;  %v431_v60 = vpop.permute.xlu0 %430  ;;  %v1622_v11 = vcombine.low %v966_v3, %v980_v61  ;;  %v1630_v14 = vrot.slane %v1620_v4, %v5098_v26  ;;  %v1637_v15 = vrot.slane %v4627_v6, %v5098_v26 }
  0xa2   : > { %v696_v22 = vsel %vm690_vm2, %v4931_v2, %v431_v60 }
  0xa3   : > { %v665_v63 = vpop.permute.xlu1 %664  ;;  %519 = vrot.lane.b32.xlu0 %v5090_v20, %s4860_s24  ;;  %v1644_v27 = vrot.slane %v1622_v11, %v5098_v26  ;;  %v1652_v31 = vcombine.low %v1630_v14, %v1637_v15  ;;  %v413_v11 = vshrl.u32 %v5172_v49, 16 }
  0xa4   : > { %v897_v5 = vsel %vm893_vm9, %v868_v62, %v665_v63  ;;  %v415_v62 = vshll.u32 %v5172_v49, 16 }
  0xa5   : > { %v991_v7 = vrot.slane %v897_v5, %v5098_v26  ;;  %678 = vrot.lane.b32.xlu1 %v5128_v56, %s4867_s6  ;;  %v473_v10 = vpop.permute.xlu0 %472  ;;  %v984_v18 = vcombine.high %v897_v5, %v897_v5  ;;  %v1660_v45 = vrot.slane %v1652_v31, %v5098_v26 }
  0xa6   : > { %v725_v29 = vsel %vm719_vm3, %v696_v22, %v473_v10  ;;  %v5195_v10 = vrot.slane %v5172_v49, 1 }
  0xa7   : > { %v1007_v12 = vrot.slane %v991_v7, %v5098_v26  ;;  %v541_v13 = vpop.permute.xlu1 %540  ;;  %554 = vrot.lane.b32.xlu0 %v404_v0, %s4865_s29  ;;  %v999_v21 = vcombine.high %v991_v7, %v991_v7  ;;  %v998_v32 = vrot.slane %v984_v18, %v5098_v26 }
  0xa9   : > { %616 = vrot.lane.b32.xlu1 %v5118_v46, %s4862_s26  ;;  %v1623_v24 = vcombine.low %v982_v17, %v1007_v12  ;;  %v506_v25 = vpop.permute.xlu0 %505  ;;  %v1021_v2 = vrot.slane %v999_v21, %v5098_v26  ;;  %v1000_v43 = vcombine.high %v998_v32, %v998_v32  ;;  %v1014_v44 = vrot.slane %v998_v32, %v5098_v26 }
  0xaa   : > { %v754_v34 = vsel %vm748_vm4, %v725_v29, %v506_v25  ;;  %v1029_v55 = vcombine.high %v1007_v12, %v1007_v12  ;;  %v417_v12 = vrot.slane %v415_v62, 1 }
  0xab   : > { %v603_v30 = vpop.permute.xlu1 %602  ;;  %v1651_v33 = vrot.slane %v1623_v24, %v5098_v26  ;;  %583 = vrot.lane.b32.xlu0 %v5128_v56, %s4863_s27  ;;  %v783_v38 = vsel %vm777_vm5, %v754_v34, %v541_v13  ;;  %v1031_v50 = vcombine.high %v1021_v2, %v1021_v2  ;;  %v1030_v60 = vcombine.high %v1014_v44, %v1014_v44 }
  0xac   : > { %v1669_v5 = vcombine.low %v1021_v2, %v1029_v55  ;;  %v5208_v29 = vor.u32 %v417_v12, %v413_v11 }
  0xad   : > { %651 = vrot.lane.b32.xlu1 %v5148_v1, %s4866_s30  ;;  %v1653_v37 = vcombine.low %v1644_v27, %v1651_v33  ;;  %v570_v39 = vpop.permute.xlu0 %569  ;;  %v1670_v63 = vcombine.low %v1031_v50, %v1014_v44 }
  0xae   : > { %v812_v40 = vsel %vm806_vm6, %v783_v38, %v570_v39  ;;  %v1679_v21 = vrot.slane %v1669_v5, %v5098_v26 }
  0xaf   : > { %v667_v42 = vpop.permute.xlu1 %666  ;;  %446 = vrot.lane.b32.xlu0 %v404_v0, %s4864_s28  ;;  %v1667_v48 = vrot.slane %v1653_v37, %v5098_v26  ;;  %v841_v51 = vsel %vm835_vm7, %v812_v40, %v603_v30  ;;  %v1028_v0 = vrot.slane %v1000_v43, %v5098_v26  ;;  %v1686_v14 = vrot.slane %v1670_v63, %v5098_v26  ;;  %v5220_v40 = vld [vmem:[%s4920_s23 + $0x68] sm:$0xff]  }
  0xb1   : > { %680 = vrot.lane.b32.xlu1 %v5163_v36, %s4867_s6  ;;  %v638_v52 = vpop.permute.xlu0 %637  ;;  %v1668_v54 = vcombine.low %v1660_v45, %v1667_v48  ;;  %v1671_v13 = vcombine.low %v1028_v0, %v1030_v60  ;;  %v1701_v32 = vcombine.low %v1679_v21, %v1686_v14  ;;  %v5261_v21 = vld [vmem:[%s4920_s23 + $0x70] sm:$0xff]  }
  0xb2   : > { %v870_v57 = vsel %vm864_vm8, %v841_v51, %v638_v52 }
  0xb3   : > { %v475_v58 = vpop.permute.xlu1 %474  ;;  %v899_v61 = vsel %vm893_vm9, %v870_v57, %v667_v42  ;;  %488 = vrot.lane.b32.xlu0 %v5128_v56, %s4861_s25  ;;  %4705 = vmatmul.mubr.msk.bf16.vlgmr.msra.gmra.mrb[0].mxu0 %vm2238_vm10, %v1668_v54  ;;  %v1693_v30 = vrot.slane %v1671_v13, %v5098_v26  ;;  %v1709_v42 = vrot.slane %v1701_v32, %v5098_v26 }
  0xb4   : > { %v1032_v3 = vcombine.high %v899_v61, %v899_v61  ;;  %v1039_v4 = vrot.slane %v899_v61, %v5098_v26  ;;  %4708 = vmatprep.mubr.msk.bf16.mxu0 %vm4869_vm1, %v4868_v23 }
  0xb5   : > { %556 = vrot.lane.b32.xlu1 %v5148_v1, %s4865_s29  ;;  %v433_v6 = vpop.permute.xlu0 %432 }
  0xb6   : > { %v1047_v7 = vcombine.high %v1039_v4, %v1039_v4  ;;  %v698_v56 = vsel %vm690_vm2, %v4948_v16, %v433_v6  ;;  %v1046_v9 = vrot.slane %v1032_v3, %v5098_v26  ;;  %v1055_v15 = vrot.slane %v1039_v4, %v5098_v26 }
  0xb7   : > { %v543_v8 = vpop.permute.xlu1 %542  ;;  %521 = vrot.lane.b32.xlu0 %v5118_v46, %s4860_s24  ;;  %v727_v16 = vsel %vm719_vm3, %v698_v56, %v475_v58 }
  0xb8   : > { %v1069_v17 = vrot.slane %v1047_v7, %v5098_v26  ;;  %v1048_v27 = vcombine.high %v1046_v9, %v1046_v9  ;;  %v1062_v44 = vrot.slane %v1046_v9, %v5098_v26  ;;  %v5251_v9 = vrot.slane %v5220_v40, 1 }
  0xb9   : > { %618 = vrot.lane.b32.xlu1 %v5172_v49, %s4862_s26  ;;  %v508_v18 = vpop.permute.xlu0 %507 }
  0xba   : > { %v1672_v22 = vcombine.low %v1055_v15, %v1069_v17  ;;  %v756_v24 = vsel %vm748_vm4, %v727_v16, %v508_v18  ;;  %v1076_v39 = vrot.slane %v1048_v27, %v5098_v26  ;;  %v4628_v0 = vcombine.high %v1055_v15, %v1069_v17 }
  0xbb   : > { %v605_v25 = vpop.permute.xlu1 %604  ;;  %585 = vrot.lane.b32.xlu0 %v5163_v36, %s4863_s27  ;;  %v785_v33 = vsel %vm777_vm5, %v756_v24, %v543_v8  ;;  %v1078_v4 = vcombine.high %v1062_v44, %v1062_v44 }
  0xbc   : > { %v1700_v31 = vrot.slane %v1672_v22, %v5098_v26  ;;  %v1719_v54 = vcombine.low %v1062_v44, %v1076_v39  ;;  %v1728_v11 = vrot.slane %v4628_v0, %v5098_v26 }
  0xbd   : > { %682 = vrot.lane.b32.xlu1 %v5195_v10, %s4867_s6  ;;  %v572_v34 = vpop.permute.xlu0 %571 }
  0xbe   : > { %v814_v2 = vsel %vm806_vm6, %v785_v33, %v572_v34  ;;  %v1702_v38 = vcombine.low %v1693_v30, %v1700_v31  ;;  %v1735_v3 = vrot.slane %v1719_v54, %v5098_v26 }
  0xbf   : > { %v669_v37 = vpop.permute.xlu1 %668  ;;  %653 = vrot.lane.b32.xlu0 %v5208_v29, %s4866_s30  ;;  %v843_v45 = vsel %vm835_vm7, %v814_v2, %v605_v25 }
  0xc0   : > { %v1716_v43 = vrot.slane %v1702_v38, %v5098_v26  ;;  %v1750_v18 = vcombine.low %v1728_v11, %v1735_v3  ;;  %v532_v38 = vshll.u32 %v5261_v21, 16 }
  0xc1   : > { %490 = vrot.lane.b32.xlu1 %v5163_v36, %s4861_s25  ;;  %v640_v48 = vpop.permute.xlu0 %639  ;;  %v422_v36 = vshll.u32 %v5220_v40, 16 }
  0xc2   : > { %v872_v50 = vsel %vm864_vm8, %v843_v45, %v640_v48  ;;  %v1717_v52 = vcombine.low %v1709_v42, %v1716_v43  ;;  %v1758_v43 = vrot.slane %v1750_v18, %v5098_v26 }
  0xc3   : > { %v477_v51 = vpop.permute.xlu1 %476  ;;  %v901_v55 = vsel %vm893_vm9, %v872_v50, %v669_v37  ;;  %448 = vrot.lane.b32.xlu0 %v5148_v1, %s4864_s28  ;;  %v420_v1 = vshrl.u32 %v5220_v40, 16  ;;  %v424_v5 = vrot.slane %v422_v36, 1  ;;  %v534_v36 = vrot.slane %v532_v38, 1 }
  0xc4   : > { %v1080_v57 = vcombine.high %v901_v55, %v901_v55  ;;  %v1087_v58 = vrot.slane %v901_v55, %v5098_v26  ;;  %4709 = vmatmul.mubr.msk.bf16.gmra.mrb[4].mxu0 %vm2238_vm10, %v1717_v52  ;;  %v530_v55 = vshrl.u32 %v5261_v21, 16 }
  0xc5   : > { %558 = vrot.lane.b32.xlu1 %v5208_v29, %s4865_s29  ;;  %v435_v60 = vpop.permute.xlu0 %434  ;;  %4712 = vmatprep.mubr.msk.bf16.mxu0 %vm4869_vm1, %v4868_v23  ;;  %v5258_v16 = vor.u32 %v424_v5, %v420_v1 }
  0xc6   : > { %v1095_v61 = vcombine.high %v1087_v58, %v1087_v58  ;;  %v1103_v62 = vrot.slane %v1087_v58, %v5098_v26  ;;  %v700_v6 = vsel %vm690_vm2, %v4980_v28, %v435_v60  ;;  %v1094_v7 = vrot.slane %v1080_v57, %v5098_v26 }
  0xc7   : > { %v545_v63 = vpop.permute.xlu1 %544  ;;  %523 = vrot.lane.b32.xlu0 %v5172_v49, %s4860_s24  ;;  %v729_v14 = vsel %vm719_vm3, %v700_v6, %v477_v51 }
  0xc8   : > { %v1117_v56 = vrot.slane %v1095_v61, %v5098_v26  ;;  %v1125_v8 = vcombine.high %v1103_v62, %v1103_v62  ;;  %v1720_v12 = vcombine.low %v1078_v4, %v1103_v62  ;;  %v1096_v22 = vcombine.high %v1094_v7, %v1094_v7 }
  0xc9   : > { %620 = vrot.lane.b32.xlu1 %v5220_v40, %s4862_s26  ;;  %v510_v28 = vpop.permute.xlu0 %509  ;;  %v1110_v24 = vrot.slane %v1094_v7, %v5098_v26 }
  0xca   : > { %v1721_v13 = vcombine.low %v1117_v56, %v1125_v8  ;;  %v758_v17 = vsel %vm748_vm4, %v729_v14, %v510_v28  ;;  %v1742_v25 = vrot.slane %v1720_v12, %v5098_v26  ;;  %v1127_v2 = vcombine.high %v1117_v56, %v1117_v56 }
  0xcb   : > { %v607_v15 = vpop.permute.xlu1 %606  ;;  %587 = vrot.lane.b32.xlu0 %v5195_v10, %s4863_s27  ;;  %v787_v30 = vsel %vm777_vm5, %v758_v17, %v545_v63  ;;  %v1124_v39 = vrot.slane %v1096_v22, %v5098_v26  ;;  %v1126_v42 = vcombine.high %v1110_v24, %v1110_v24  ;;  %v564_v12 = vrot.slane %v5261_v21, 1 }
  0xcc   : > { %v1749_v27 = vrot.slane %v1721_v13, %v5098_v26  ;;  %v1767_v52 = vcombine.low %v1127_v2, %v1110_v24 }
  0xcd   : > { %684 = vrot.lane.b32.xlu1 %v5251_v9, %s4867_s6  ;;  %v574_v31 = vpop.permute.xlu0 %573  ;;  %v1768_v57 = vcombine.low %v1124_v39, %v1126_v42 }
  0xce   : > { %v816_v32 = vsel %vm806_vm6, %v787_v30, %v574_v31  ;;  %v1751_v34 = vcombine.low %v1742_v25, %v1749_v27  ;;  %v1777_v61 = vrot.slane %v1767_v52, %v5098_v26  ;;  %v4845_v25 = vld [vmem:[%s4920_s23 + $0x78] sm:$0xff]  }
  0xcf   : > { %v642_v33 = vpop.permute.xlu1 %641  ;;  %v845_v37 = vsel %vm835_vm7, %v816_v32, %v607_v15  ;;  %655 = vrot.lane.b32.xlu0 %v5258_v16, %s4866_s30  ;;  %v1784_v3 = vrot.slane %v1768_v57, %v5098_v26 }
  0xd0   : > { %v1765_v44 = vrot.slane %v1751_v34, %v5098_v26  ;;  %v874_v48 = vsel %vm864_vm8, %v845_v37, %v642_v33 }
  0xd1   : > { %492 = vrot.lane.b32.xlu1 %v5195_v10, %s4861_s25  ;;  %v437_v45 = vpop.permute.xlu0 %436  ;;  %v1799_v14 = vcombine.low %v1777_v61, %v1784_v3 }
  0xd2   : > { %v1766_v51 = vcombine.low %v1758_v43, %v1765_v44  ;;  %v702_v4 = vsel %vm690_vm2, %v5000_v35, %v437_v45 }
  0xd3   : > { %v671_v50 = vpop.permute.xlu1 %670  ;;  %450 = vrot.lane.b32.xlu0 %v5208_v29, %s4864_s28  ;;  %v535_v29 = vor.u32 %v534_v36, %v530_v55  ;;  %v1807_v30 = vrot.slane %v1799_v14, %v5098_v26  ;;  %v627_v55 = vshrl.u32 %v4845_v25, 16 }
  0xd4   : > { %v903_v54 = vsel %vm893_vm9, %v874_v48, %v671_v50  ;;  %4713 = vmatmul.mubr.msk.bf16.gmra.mrb[8].mxu0 %vm2238_vm10, %v1766_v51 }
  0xd5   : > { %v1135_v10 = vrot.slane %v903_v54, %v5098_v26  ;;  %560 = vrot.lane.b32.xlu1 %v5258_v16, %s4865_s29  ;;  %v479_v58 = vpop.permute.xlu0 %478  ;;  %4716 = vmatprep.mubr.msk.bf16.mxu0 %vm4869_vm1, %v4868_v23  ;;  %v1128_v62 = vcombine.high %v903_v54, %v903_v54 }
  0xd6   : > { %v731_v56 = vsel %vm719_vm3, %v702_v4, %v479_v58 }
  0xd7   : > { %v1143_v0 = vcombine.high %v1135_v10, %v1135_v10  ;;  %v547_v60 = vpop.permute.xlu1 %546  ;;  %525 = vrot.lane.b32.xlu0 %v5220_v40, %s4860_s24  ;;  %v1151_v63 = vrot.slane %v1135_v10, %v5098_v26  ;;  %v1142_v28 = vrot.slane %v1128_v62, %v5098_v26 }
  0xd9   : > { %v1165_v1 = vrot.slane %v1143_v0, %v5098_v26  ;;  %622 = vrot.lane.b32.xlu1 %v5261_v21, %s4862_s26  ;;  %v512_v6 = vpop.permute.xlu0 %511  ;;  %v1144_v27 = vcombine.high %v1142_v28, %v1142_v28  ;;  %v1158_v38 = vrot.slane %v1142_v28, %v5098_v26  ;;  %v661_v0 = vrot.slane %v4845_v25, 1 }
  0xda   : > { %v760_v11 = vsel %vm748_vm4, %v731_v56, %v512_v6 }
  0xdb   : > { %v1769_v5 = vcombine.low %v1151_v63, %v1165_v1  ;;  %v4629_v7 = vcombine.high %v1151_v63, %v1165_v1  ;;  %v609_v8 = vpop.permute.xlu1 %608  ;;  %589 = vrot.lane.b32.xlu0 %v5251_v9, %s4863_s27  ;;  %v789_v15 = vsel %vm777_vm5, %v760_v11, %v547_v60  ;;  %v1172_v42 = vrot.slane %v1144_v27, %v5098_v26 }
  0xdc   : > { %v1174_v52 = vcombine.high %v1158_v38, %v1158_v38 }
  0xdd   : > { %v1791_v13 = vrot.slane %v1769_v5, %v5098_v26  ;;  %v1798_v35 = vrot.slane %v4629_v7, %v5098_v26  ;;  %657 = vrot.lane.b32.xlu1 %v535_v29, %s4866_s30  ;;  %v576_v17 = vpop.permute.xlu0 %575  ;;  %v1816_v57 = vcombine.low %v1158_v38, %v1172_v42 }
  0xde   : > { %v818_v22 = vsel %vm806_vm6, %v789_v15, %v576_v17 }
  0xdf   : > { %v1800_v18 = vcombine.low %v1791_v13, %v1798_v35  ;;  %v673_v24 = vpop.permute.xlu1 %672  ;;  %452 = vrot.lane.b32.xlu0 %v5258_v16, %s4864_s28  ;;  %v847_v32 = vsel %vm835_vm7, %v818_v22, %v609_v8  ;;  %v629_v16 = vshll.u32 %v4845_v25, 16  ;;  %v1826_v6 = vrot.slane %v1816_v57, %v5098_v26 }
  0xe1   : > { %686 = vrot.lane.b32.xlu1 %v564_v12, %s4867_s6  ;;  %v1814_v31 = vrot.slane %v1800_v18, %v5098_v26  ;;  %v644_v33 = vpop.permute.xlu0 %643  ;;  %v631_v36 = vrot.slane %v629_v16, 1 }
  0xe2   : > { %v876_v34 = vsel %vm864_vm8, %v847_v32, %v644_v33 }
  0xe3   : > { %v481_v2 = vpop.permute.xlu1 %480  ;;  %v1815_v37 = vcombine.low %v1807_v30, %v1814_v31  ;;  %v905_v39 = vsel %vm893_vm9, %v876_v34, %v673_v24  ;;  %494 = vrot.lane.b32.xlu0 %v5251_v9, %s4861_s25  ;;  %v632_v4 = vor.u32 %v631_v36, %v627_v55 }
  0xe4   : > { %v1176_v43 = vcombine.high %v905_v39, %v905_v39  ;;  %v1183_v44 = vrot.slane %v905_v39, %v5098_v26 }
  0xe5   : > { %4717 = vmatmul.mubr.msk.bf16.gmra.mrb[12].mxu0 %vm2238_vm10, %v1815_v37  ;;  %562 = vrot.lane.b32.xlu1 %v535_v29, %s4865_s29  ;;  %v439_v45 = vpop.permute.xlu0 %438 }
  0xe6   : > { %4720 = vmatprep.mubr.msk.bf16.mxu0 %vm4869_vm1, %v4868_v23  ;;  %v1190_v48 = vrot.slane %v1176_v43, %v5098_v26  ;;  %v1191_v50 = vcombine.high %v1183_v44, %v1183_v44  ;;  %v1199_v51 = vrot.slane %v1183_v44, %v5098_v26  ;;  %v704_v54 = vsel %vm690_vm2, %v5015_v41, %v439_v45 }
  0xe7   : > { %v549_v9 = vpop.permute.xlu1 %548  ;;  %527 = vrot.lane.b32.xlu0 %v5261_v21, %s4860_s24  ;;  %v733_v41 = vsel %vm719_vm3, %v704_v54, %v481_v2  ;;  %s4875_s24 = smov 56  }
  0xe8   : > { %v1213_v10 = vrot.slane %v1191_v50, %v5098_v26  ;;  %v1221_v58 = vcombine.high %v1199_v51, %v1199_v51  ;;  %v1817_v60 = vcombine.low %v1174_v52, %v1199_v51  ;;  %v1206_v29 = vrot.slane %v1190_v48, %v5098_v26 }
  0xe9   : > { %624 = vrot.lane.b32.xlu1 %v4845_v25, %s4862_s26  ;;  %v514_v61 = vpop.permute.xlu0 %513  ;;  %v1192_v14 = vcombine.high %v1190_v48, %v1190_v48 }
  0xea   : > { %v1223_v62 = vcombine.high %v1213_v10, %v1213_v10  ;;  %v1818_v63 = vcombine.low %v1213_v10, %v1221_v58  ;;  %v1833_v21 = vrot.slane %v1817_v60, %v5098_v26  ;;  %v762_v3 = vsel %vm748_vm4, %v733_v41, %v514_v61 }
  0xeb   : > { %v611_v1 = vpop.permute.xlu1 %610  ;;  %591 = vrot.lane.b32.xlu0 %v564_v12, %s4863_s27  ;;  %v791_v7 = vsel %vm777_vm5, %v762_v3, %v549_v9  ;;  %v1220_v27 = vrot.slane %v1192_v14, %v5098_v26  ;;  %v1222_v31 = vcombine.high %v1206_v29, %v1206_v29 }
  0xec   : > { %v1819_v5 = vcombine.low %v1223_v62, %v1206_v29  ;;  %v1840_v8 = vrot.slane %v1818_v63, %v5098_v26  ;;  %v1848_v35 = vcombine.low %v1826_v6, %v1833_v21 }
  0xed   : > { %688 = vrot.lane.b32.xlu1 %v661_v0, %s4867_s6  ;;  %v578_v56 = vpop.permute.xlu0 %577  ;;  %v1865_v42 = vcombine.low %v1220_v27, %v1222_v31 }
  0xee   : > { %v1847_v11 = vrot.slane %v1819_v5, %v5098_v26  ;;  %v820_v28 = vsel %vm806_vm6, %v791_v7, %v578_v56  ;;  %v1856_v24 = vrot.slane %v1848_v35, %v5098_v26 }
  0xef   : > { %v675_v13 = vpop.permute.xlu1 %674  ;;  %659 = vrot.lane.b32.xlu0 %v632_v4, %s4866_s30  ;;  %v849_v15 = vsel %vm835_vm7, %v820_v28, %v611_v1  ;;  %v1875_v10 = vrot.slane %v1865_v42, %v5098_v26 }
  0xf0   : > { %v1849_v12 = vcombine.low %v1840_v8, %v1847_v11 }
  0xf1   : > { %v646_v17 = vpop.permute.xlu0 %645 }
  0xf2   : > { %v878_v18 = vsel %vm864_vm8, %v849_v15, %v646_v17  ;;  %v1863_v25 = vrot.slane %v1849_v12, %v5098_v26 }
  0xf3   : > { %v483_v22 = vpop.permute.xlu1 %482  ;;  %v907_v30 = vsel %vm893_vm9, %v878_v18, %v675_v13 }
  0xf4   : > { %v1224_v32 = vcombine.high %v907_v30, %v907_v30  ;;  %v1231_v33 = vrot.slane %v907_v30, %v5098_v26  ;;  %v1864_v34 = vcombine.low %v1856_v24, %v1863_v25 }
  0xf5   : > { %v441_v2 = vpop.permute.xlu0 %440 }
  0xf6   : > { %v1238_v37 = vrot.slane %v1224_v32, %v5098_v26  ;;  %v1239_v38 = vcombine.high %v1231_v33, %v1231_v33  ;;  %v706_v39 = vsel %vm690_vm2, %v5032_v47, %v441_v2  ;;  %4721 = vmatmul.mubr.msk.bf16.gmra.mrb[16].mxu0 %vm2238_vm10, %v1864_v34  ;;  %v1247_v44 = vrot.slane %v1231_v33, %v5098_v26 }
  0xf7   : > { %v551_v16 = vpop.permute.xlu1 %550  ;;  %4724 = vmatprep.mubr.msk.bf16.mxu0 %vm4869_vm1, %v4868_v23  ;;  %v735_v50 = vsel %vm719_vm3, %v706_v39, %v483_v22 }
  0xf8   : > { %v1240_v43 = vcombine.high %v1238_v37, %v1238_v37  ;;  %v1261_v45 = vrot.slane %v1239_v38, %v5098_v26  ;;  %v1254_v48 = vrot.slane %v1238_v37, %v5098_v26 }
  0xf9   : > { %v516_v51 = vpop.permute.xlu0 %515 }
  0xfa   : > { %v1268_v9 = vrot.slane %v1240_v43, %v5098_v26  ;;  %v1866_v47 = vcombine.low %v1247_v44, %v1261_v45  ;;  %v4630_v52 = vcombine.high %v1247_v44, %v1261_v45  ;;  %v764_v54 = vsel %vm748_vm4, %v735_v50, %v516_v51 }
  0xfb   : > { %v613_v55 = vpop.permute.xlu1 %612  ;;  %v793_v58 = vsel %vm777_vm5, %v764_v54, %v551_v16  ;;  %v1270_v15 = vcombine.high %v1254_v48, %v1254_v48 }
  0xfc   : > { %v1868_v36 = vcombine.low %v1254_v48, %v1268_v9  ;;  %v1882_v57 = vrot.slane %v1866_v47, %v5098_v26  ;;  %v1889_v60 = vrot.slane %v4630_v52, %v5098_v26 }
  0xfd   : > { %v580_v0 = vpop.permute.xlu0 %579 }
  0xfe   : > { %v1896_v61 = vrot.slane %v1868_v36, %v5098_v26  ;;  %v822_v29 = vsel %vm806_vm6, %v793_v58, %v580_v0  ;;  %v1897_v63 = vcombine.low %v1875_v10, %v1882_v57 }
  0xff   : > { %v677_v62 = vpop.permute.xlu1 %676  ;;  %v851_v1 = vsel %vm835_vm7, %v822_v29, %v613_v55 }
 0x100   : > { %v1898_v41 = vcombine.low %v1889_v60, %v1896_v61  ;;  %v1905_v6 = vrot.slane %v1897_v63, %v5098_v26 }
 0x101   : > { %v648_v21 = vpop.permute.xlu0 %647 }
 0x102   : > { %v880_v3 = vsel %vm864_vm8, %v851_v1, %v648_v21  ;;  %v1912_v5 = vrot.slane %v1898_v41, %v5098_v26 }
 0x103   : > { %v485_v4 = vpop.permute.xlu1 %484  ;;  %v909_v7 = vsel %vm893_vm9, %v880_v3, %v677_v62 }
 0x104   : > { %v1272_v56 = vcombine.high %v909_v7, %v909_v7  ;;  %v1279_v8 = vrot.slane %v909_v7, %v5098_v26  ;;  %v1913_v11 = vcombine.low %v1905_v6, %v1912_v5 }
 0x105   : > { %v443_v28 = vpop.permute.xlu0 %442 }
 0x106   : > { %v1286_v13 = vrot.slane %v1272_v56, %v5098_v26  ;;  %v1287_v35 = vcombine.high %v1279_v8, %v1279_v8  ;;  %v1295_v14 = vrot.slane %v1279_v8, %v5098_v26  ;;  %4725 = vmatmul.mubr.msk.bf16.gmra.mrb[20].mxu0 %vm2238_vm10, %v1913_v11  ;;  %v708_v27 = vsel %vm690_vm2, %v5048_v53, %v443_v28 }
 0x107   : > { %v553_v12 = vpop.permute.xlu1 %552  ;;  %4728 = vmatprep.mubr.msk.bf16.mxu0 %vm4869_vm1, %v4868_v23  ;;  %v737_v42 = vsel %vm719_vm3, %v708_v27, %v485_v4 }
 0x108   : > { %v1288_v17 = vcombine.high %v1286_v13, %v1286_v13  ;;  %v1302_v18 = vrot.slane %v1286_v13, %v5098_v26  ;;  %v1309_v22 = vrot.slane %v1287_v35, %v5098_v26  ;;  %v1317_v24 = vcombine.high %v1295_v14, %v1295_v14 }
 0x109   : > { %v1914_v25 = vcombine.low %v1270_v15, %v1295_v14  ;;  %v518_v30 = vpop.permute.xlu0 %517 }
 0x10a   : > { %v1316_v31 = vrot.slane %v1288_v17, %v5098_v26  ;;  %v1318_v32 = vcombine.high %v1302_v18, %v1302_v18  ;;  %v1319_v33 = vcombine.high %v1309_v22, %v1309_v22  ;;  %v1915_v34 = vcombine.low %v1309_v22, %v1317_v24 }
 0x10b   : > { %v582_v2 = vpop.permute.xlu1 %581  ;;  %v1924_v39 = vrot.slane %v1914_v25, %v5098_v26  ;;  %v766_v53 = vsel %vm748_vm4, %v737_v42, %v518_v30 }
 0x10c   : > { %v1916_v37 = vcombine.low %v1319_v33, %v1302_v18  ;;  %v1917_v38 = vcombine.low %v1316_v31, %v1318_v32  ;;  %v1931_v16 = vrot.slane %v1915_v34, %v5098_v26  ;;  %v795_v9 = vsel %vm777_vm5, %v766_v53, %v553_v12 }
 0x10d   : > { %v445_v43 = vpop.permute.xlu0 %444  ;;  %v824_v36 = vsel %vm806_vm6, %v795_v9, %v582_v2 }
 0x10e   : > { %v1938_v44 = vrot.slane %v1916_v37, %v5098_v26  ;;  %v1945_v48 = vrot.slane %v1917_v38, %v5098_v26  ;;  %v1946_v50 = vcombine.low %v1924_v39, %v1931_v16  ;;  %v710_v41 = vsel %vm690_vm2, %v5064_v59, %v445_v43 }
 0x10f   : > { %v615_v45 = vpop.permute.xlu1 %614 }
 0x110   : > { %v1947_v51 = vcombine.low %v1938_v44, %v1945_v48  ;;  %v1954_v54 = vrot.slane %v1946_v50, %v5098_v26  ;;  %v853_v10 = vsel %vm835_vm7, %v824_v36, %v615_v45 }
 0x111   : > { %v487_v47 = vpop.permute.xlu0 %486 }
 0x112   : > { %v1961_v55 = vrot.slane %v1947_v51, %v5098_v26  ;;  %v739_v3 = vsel %vm719_vm3, %v710_v41, %v487_v47 }
 0x113   : > { %v650_v52 = vpop.permute.xlu1 %649 }
 0x114   : > { %v1962_v57 = vcombine.low %v1954_v54, %v1961_v55  ;;  %v882_v0 = vsel %vm864_vm8, %v853_v10, %v650_v52 }
 0x115   : > { %v520_v58 = vpop.permute.xlu0 %519 }
 0x116   : > { %4729 = vmatmul.mubr.msk.bf16.gmra.mrb[24].mxu0 %vm2238_vm10, %v1962_v57  ;;  %v768_v6 = vsel %vm748_vm4, %v739_v3, %v520_v58 }
 0x117   : > { %v679_v60 = vpop.permute.xlu1 %678  ;;  %4732 = vmatprep.mubr.msk.bf16.mxu0 %vm4869_vm1, %v4868_v23 }
 0x118   : > { %v911_v61 = vsel %vm893_vm9, %v882_v0, %v679_v60 }
 0x119   : > { %v1320_v29 = vcombine.high %v911_v61, %v911_v61  ;;  %v1327_v62 = vrot.slane %v911_v61, %v5098_v26  ;;  %v555_v63 = vpop.permute.xlu0 %554 }
 0x11a   : > { %v797_v5 = vsel %vm777_vm5, %v768_v6, %v555_v63 }
 0x11b   : > { %v1334_v1 = vrot.slane %v1320_v29, %v5098_v26  ;;  %v617_v21 = vpop.permute.xlu1 %616  ;;  %v1335_v4 = vcombine.high %v1327_v62, %v1327_v62  ;;  %v1343_v59 = vrot.slane %v1327_v62, %v5098_v26 }
 0x11d   : > { %v584_v7 = vpop.permute.xlu0 %583  ;;  %v1336_v56 = vcombine.high %v1334_v1, %v1334_v1  ;;  %v1357_v28 = vrot.slane %v1335_v4, %v5098_v26  ;;  %v1350_v17 = vrot.slane %v1334_v1, %v5098_v26 }
 0x11e   : > { %v826_v8 = vsel %vm806_vm6, %v797_v5, %v584_v7 }
 0x11f   : > { %v652_v11 = vpop.permute.xlu1 %651  ;;  %v855_v13 = vsel %vm835_vm7, %v826_v8, %v617_v21  ;;  %v1364_v14 = vrot.slane %v1336_v56, %v5098_v26  ;;  %v1963_v18 = vcombine.low %v1343_v59, %v1357_v28  ;;  %v4631_v22 = vcombine.high %v1343_v59, %v1357_v28 }
 0x120   : > { %v884_v12 = vsel %vm864_vm8, %v855_v13, %v652_v11  ;;  %v1366_v2 = vcombine.high %v1350_v17, %v1350_v17 }
 0x121   : > { %v447_v35 = vpop.permute.xlu0 %446  ;;  %v1965_v30 = vcombine.low %v1350_v17, %v1364_v14  ;;  %v1973_v33 = vrot.slane %v1963_v18, %v5098_v26  ;;  %v1980_v34 = vrot.slane %v4631_v22, %v5098_v26 }
 0x122   : > { %v712_v39 = vsel %vm690_vm2, %v5090_v20, %v447_v35 }
 0x123   : > { %v681_v15 = vpop.permute.xlu1 %680  ;;  %v1987_v43 = vrot.slane %v1965_v30, %v5098_v26  ;;  %v1995_v45 = vcombine.low %v1973_v33, %v1980_v34 }
 0x124   : > { %v913_v24 = vsel %vm893_vm9, %v884_v12, %v681_v15 }
 0x125   : > { %v1375_v25 = vrot.slane %v913_v24, %v5098_v26  ;;  %v489_v27 = vpop.permute.xlu0 %488  ;;  %v1368_v37 = vcombine.high %v913_v24, %v913_v24  ;;  %v2003_v10 = vrot.slane %v1995_v45, %v5098_v26 }
 0x126   : > { %v741_v44 = vsel %vm719_vm3, %v712_v39, %v489_v27 }
 0x127   : > { %v1391_v31 = vrot.slane %v1375_v25, %v5098_v26  ;;  %v557_v32 = vpop.permute.xlu1 %556  ;;  %v1383_v38 = vcombine.high %v1375_v25, %v1375_v25  ;;  %v1382_v48 = vrot.slane %v1368_v37, %v5098_v26 }
 0x129   : > { %v1966_v16 = vcombine.low %v1366_v2, %v1391_v31  ;;  %v522_v42 = vpop.permute.xlu0 %521  ;;  %v1405_v9 = vrot.slane %v1383_v38, %v5098_v26  ;;  %v1384_v36 = vcombine.high %v1382_v48, %v1382_v48  ;;  %v1398_v57 = vrot.slane %v1382_v48, %v5098_v26 }
 0x12a   : > { %v770_v51 = vsel %vm748_vm4, %v741_v44, %v522_v42  ;;  %v1413_v62 = vcombine.high %v1391_v31, %v1391_v31 }
 0x12b   : > { %v619_v53 = vpop.permute.xlu1 %618  ;;  %v1994_v50 = vrot.slane %v1966_v16, %v5098_v26  ;;  %v799_v52 = vsel %vm777_vm5, %v770_v51, %v557_v32  ;;  %v1415_v0 = vcombine.high %v1405_v9, %v1405_v9  ;;  %v1412_v1 = vrot.slane %v1384_v36, %v5098_v26 }
 0x12c   : > { %v1414_v21 = vcombine.high %v1398_v57, %v1398_v57  ;;  %v2012_v56 = vcombine.low %v1405_v9, %v1413_v62 }
 0x12d   : > { %v1996_v47 = vcombine.low %v1987_v43, %v1994_v50  ;;  %v586_v20 = vpop.permute.xlu0 %585  ;;  %v2013_v4 = vcombine.low %v1415_v0, %v1398_v57 }
 0x12e   : > { %v828_v54 = vsel %vm806_vm6, %v799_v52, %v586_v20  ;;  %v2014_v13 = vcombine.low %v1412_v1, %v1414_v21  ;;  %v2022_v18 = vrot.slane %v2012_v56, %v5098_v26 }
 0x12f   : > { %v683_v55 = vpop.permute.xlu1 %682  ;;  %v2010_v58 = vrot.slane %v1996_v47, %v5098_v26  ;;  %v857_v60 = vsel %vm835_vm7, %v828_v54, %v619_v53  ;;  %v2029_v59 = vrot.slane %v2013_v4, %v5098_v26 }
 0x131   : > { %v654_v61 = vpop.permute.xlu0 %653  ;;  %v2011_v29 = vcombine.low %v2003_v10, %v2010_v58  ;;  %v2044_v31 = vcombine.low %v2022_v18, %v2029_v59 }
 0x132   : > { %v886_v63 = vsel %vm864_vm8, %v857_v60, %v654_v61 }
 0x133   : > { %v491_v41 = vpop.permute.xlu1 %490  ;;  %v915_v3 = vsel %vm893_vm9, %v886_v63, %v683_v55  ;;  %4733 = vmatmul.mubr.msk.bf16.gmra.mrb[28].mxu0 %vm2238_vm10, %v2011_v29  ;;  %v2052_v39 = vrot.slane %v2044_v31, %v5098_v26 }
 0x134   : > { %v1416_v6 = vcombine.high %v915_v3, %v915_v3  ;;  %v1423_v5 = vrot.slane %v915_v3, %v5098_v26  ;;  %4736 = vmatprep.mubr.msk.bf16.mxu0 %vm4869_vm1, %v4868_v23 }
 0x135   : > { %v449_v7 = vpop.permute.xlu0 %448 }
 0x136   : > { %v1431_v8 = vcombine.high %v1423_v5, %v1423_v5  ;;  %v714_v11 = vsel %vm690_vm2, %v5118_v46, %v449_v7  ;;  %v1430_v35 = vrot.slane %v1416_v6, %v5098_v26  ;;  %v1439_v14 = vrot.slane %v1423_v5, %v5098_v26 }
 0x137   : > { %v559_v28 = vpop.permute.xlu1 %558  ;;  %v743_v15 = vsel %vm719_vm3, %v714_v11, %v491_v41  ;;  %v2036_v46 = vrot.slane %v2014_v13, %v5098_v26 }
 0x138   : > { %v1453_v12 = vrot.slane %v1431_v8, %v5098_v26  ;;  %v1432_v27 = vcombine.high %v1430_v35, %v1430_v35  ;;  %v1446_v44 = vrot.slane %v1430_v35, %v5098_v26 }
 0x139   : > { %v524_v17 = vpop.permute.xlu0 %523 }
 0x13a   : > { %v2015_v22 = vcombine.low %v1439_v14, %v1453_v12  ;;  %v772_v24 = vsel %vm748_vm4, %v743_v15, %v524_v17  ;;  %v1460_v38 = vrot.slane %v1432_v27, %v5098_v26  ;;  %v4632_v20 = vcombine.high %v1439_v14, %v1453_v12 }
 0x13b   : > { %v621_v25 = vpop.permute.xlu1 %620  ;;  %v801_v32 = vsel %vm777_vm5, %v772_v24, %v559_v28  ;;  %v1462_v57 = vcombine.high %v1446_v44, %v1446_v44 }
 0x13c   : > { %v2043_v30 = vrot.slane %v2015_v22, %v5098_v26  ;;  %v2062_v51 = vcombine.low %v1446_v44, %v1460_v38  ;;  %v2071_v63 = vrot.slane %v4632_v20, %v5098_v26 }
 0x13d   : > { %v588_v33 = vpop.permute.xlu0 %587 }
 0x13e   : > { %v830_v34 = vsel %vm806_vm6, %v801_v32, %v588_v33  ;;  %v2045_v37 = vcombine.low %v2036_v46, %v2043_v30  ;;  %v2078_v0 = vrot.slane %v2062_v51, %v5098_v26 }
 0x13f   : > { %v685_v2 = vpop.permute.xlu1 %684  ;;  %v859_v42 = vsel %vm835_vm7, %v830_v34, %v621_v25 }
 0x140   : > { %v2059_v16 = vrot.slane %v2045_v37, %v5098_v26  ;;  %v2093_v7 = vcombine.low %v2071_v63, %v2078_v0 }
 0x141   : > { %v656_v43 = vpop.permute.xlu0 %655 }
 0x142   : > { %v888_v53 = vsel %vm864_vm8, %v859_v42, %v656_v43  ;;  %v2060_v48 = vcombine.low %v2052_v39, %v2059_v16  ;;  %v2101_v15 = vrot.slane %v2093_v7, %v5098_v26 }
 0x143   : > { %v493_v45 = vpop.permute.xlu1 %492  ;;  %v917_v50 = vsel %vm893_vm9, %v888_v53, %v685_v2 }
 0x144   : > { %v1464_v9 = vcombine.high %v917_v50, %v917_v50  ;;  %v1471_v47 = vrot.slane %v917_v50, %v5098_v26  ;;  %4737 = vmatmul.mubr.msk.bf16.gmra.mrb[32].mxu0 %vm2238_vm10, %v2060_v48 }
 0x145   : > { %v451_v52 = vpop.permute.xlu0 %450  ;;  %4740 = vmatprep.mubr.msk.bf16.mxu0 %vm4869_vm1, %v4868_v23 }
 0x146   : > { %v1479_v54 = vcombine.high %v1471_v47, %v1471_v47  ;;  %v1487_v55 = vrot.slane %v1471_v47, %v5098_v26  ;;  %v1478_v10 = vrot.slane %v1464_v9, %v5098_v26  ;;  %v716_v58 = vsel %vm690_vm2, %v5172_v49, %v451_v52 }
 0x147   : > { %v561_v36 = vpop.permute.xlu1 %560  ;;  %v745_v1 = vsel %vm719_vm3, %v716_v58, %v493_v45 }
 0x148   : > { %v1501_v60 = vrot.slane %v1479_v54, %v5098_v26  ;;  %v1509_v61 = vcombine.high %v1487_v55, %v1487_v55  ;;  %v2063_v29 = vcombine.low %v1462_v57, %v1487_v55  ;;  %v1480_v3 = vcombine.high %v1478_v10, %v1478_v10 }
 0x149   : > { %v526_v62 = vpop.permute.xlu0 %525  ;;  %v1494_v4 = vrot.slane %v1478_v10, %v5098_v26 }
 0x14a   : > { %v2064_v41 = vcombine.low %v1501_v60, %v1509_v61  ;;  %v774_v6 = vsel %vm748_vm4, %v745_v1, %v526_v62  ;;  %v2085_v49 = vrot.slane %v2063_v29, %v5098_v26  ;;  %v1508_v59 = vrot.slane %v1480_v3, %v5098_v26 }
 0x14b   : > { %v623_v21 = vpop.permute.xlu1 %622  ;;  %v803_v56 = vsel %vm777_vm5, %v774_v6, %v561_v36  ;;  %v1510_v35 = vcombine.high %v1494_v4, %v1494_v4  ;;  %v1511_v14 = vcombine.high %v1501_v60, %v1501_v60 }
 0x14c   : > { %v2092_v5 = vrot.slane %v2064_v41, %v5098_v26 }
 0x14d   : > { %v590_v8 = vpop.permute.xlu0 %589  ;;  %v2110_v46 = vcombine.low %v1511_v14, %v1494_v4  ;;  %v2111_v27 = vcombine.low %v1508_v59, %v1510_v35 }
 0x14e   : > { %v832_v11 = vsel %vm806_vm6, %v803_v56, %v590_v8  ;;  %v2094_v13 = vcombine.low %v2085_v49, %v2092_v5 }
 0x14f   : > { %v658_v28 = vpop.permute.xlu1 %657  ;;  %v861_v12 = vsel %vm835_vm7, %v832_v11, %v623_v21  ;;  %v2120_v2 = vrot.slane %v2110_v46, %v5098_v26  ;;  %v2127_v37 = vrot.slane %v2111_v27, %v5098_v26 }
 0x150   : > { %v2108_v17 = vrot.slane %v2094_v13, %v5098_v26  ;;  %v890_v22 = vsel %vm864_vm8, %v861_v12, %v658_v28 }
 0x151   : > { %v453_v18 = vpop.permute.xlu0 %452 }
 0x152   : > { %v2109_v25 = vcombine.low %v2101_v15, %v2108_v17  ;;  %v718_v38 = vsel %vm690_vm2, %v5220_v40, %v453_v18  ;;  %v2142_v40 = vcombine.low %v2120_v2, %v2127_v37 }
 0x153   : > { %v687_v24 = vpop.permute.xlu1 %686 }
 0x154   : > { %v919_v30 = vsel %vm893_vm9, %v890_v22, %v687_v24  ;;  %4741 = vmatmul.mubr.msk.bf16.gmra.mrb[36].mxu0 %vm2238_vm10, %v2109_v25  ;;  %v2150_v10 = vrot.slane %v2142_v40, %v5098_v26 }
 0x155   : > { %v1519_v31 = vrot.slane %v919_v30, %v5098_v26  ;;  %v495_v32 = vpop.permute.xlu0 %494  ;;  %4744 = vmatprep.mubr.msk.bf16.mxu0 %vm4869_vm1, %v4868_v23  ;;  %v1512_v39 = vcombine.high %v919_v30, %v919_v30 }
 0x156   : > { %v747_v43 = vsel %vm719_vm3, %v718_v38, %v495_v32  ;;  %v5538_v38 = vld [vmem:[%s6156_s2] ss:$0 sm:$0xff] }
 0x157   : > { %v1527_v33 = vcombine.high %v1519_v31, %v1519_v31  ;;  %v563_v34 = vpop.permute.xlu1 %562  ;;  %v1535_v16 = vrot.slane %v1519_v31, %v5098_v26  ;;  %v1526_v51 = vrot.slane %v1512_v39, %v5098_v26 }
 0x159   : > { %v1549_v42 = vrot.slane %v1527_v33, %v5098_v26  ;;  %v528_v44 = vpop.permute.xlu0 %527  ;;  %v1528_v36 = vcombine.high %v1526_v51, %v1526_v51  ;;  %v1542_v62 = vrot.slane %v1526_v51, %v5098_v26 }
 0x15a   : > { %v776_v48 = vsel %vm748_vm4, %v747_v43, %v528_v44 }
 0x15b   : > { %v2112_v53 = vcombine.low %v1535_v16, %v1549_v42  ;;  %v4633_v45 = vcombine.high %v1535_v16, %v1549_v42  ;;  %v625_v50 = vpop.permute.xlu1 %624  ;;  %v805_v52 = vsel %vm777_vm5, %v776_v48, %v563_v34  ;;  %v1556_v41 = vrot.slane %v1528_v36, %v5098_v26 }
 0x15c   : > { %v1558_v49 = vcombine.high %v1542_v62, %v1542_v62  ;;  %v4871_v34 = vmov 1983009808  }
 0x15d   : > { %v2134_v9 = vrot.slane %v2112_v53, %v5098_v26  ;;  %v2141_v47 = vrot.slane %v4633_v45, %v5098_v26  ;;  %v592_v20 = vpop.permute.xlu0 %591  ;;  %v2159_v5 = vcombine.low %v1542_v62, %v1556_v41  ;;  %v2470_v2 = vunpack.c.l.s4 %v4871_v34 }
 0x15e   : > { %v834_v55 = vsel %vm806_vm6, %v805_v52, %v592_v20 }
 0x15f   : > { %v2143_v54 = vcombine.low %v2134_v9, %v2141_v47  ;;  %v689_v57 = vpop.permute.xlu1 %688  ;;  %v863_v0 = vsel %vm835_vm7, %v834_v55, %v625_v50  ;;  %v2169_v35 = vrot.slane %v2159_v5, %v5098_v26  ;;  %v2471_v37 = vunpack.c.0.s8 %v2470_v2 }
 0x161   : > { %v2157_v58 = vrot.slane %v2143_v54, %v5098_v26  ;;  %v660_v60 = vpop.permute.xlu0 %659  ;;  %v5542_v42 = vsub.s32 %v2471_v37, %v5087_v19 }
 0x162   : > { %v892_v61 = vsel %vm864_vm8, %v863_v0, %v660_v60 }
 0x163   : > { %v2158_v29 = vcombine.low %v2150_v10, %v2157_v58  ;;  %v921_v63 = vsel %vm893_vm9, %v892_v61, %v689_v57 }
 0x164   : > { %v1560_v1 = vcombine.high %v921_v63, %v921_v63  ;;  %v1567_v21 = vrot.slane %v921_v63, %v5098_v26 }
 0x165   : > { %4745 = vmatmul.mubr.msk.bf16.gmra.mrb[40].mxu0 %vm2238_vm10, %v2158_v29 }
 0x166   : > { %4748 = vmatprep.mubr.msk.bf16.mxu0 %vm4869_vm1, %v4868_v23  ;;  %v1574_v3 = vrot.slane %v1560_v1, %v5098_v26  ;;  %v1575_v4 = vcombine.high %v1567_v21, %v1567_v21  ;;  %v1583_v6 = vrot.slane %v1567_v21, %v5098_v26 }
 0x168   : > { %v1597_v7 = vrot.slane %v1575_v4, %v5098_v26  ;;  %v1605_v56 = vcombine.high %v1583_v6, %v1583_v6  ;;  %v2160_v8 = vcombine.low %v1558_v49, %v1583_v6  ;;  %v1590_v11 = vrot.slane %v1574_v3, %v5098_v26 }
 0x169   : > { %v1576_v14 = vcombine.high %v1574_v3, %v1574_v3 }
 0x16a   : > { %v1607_v28 = vcombine.high %v1597_v7, %v1597_v7  ;;  %v2161_v13 = vcombine.low %v1597_v7, %v1605_v56  ;;  %v2176_v59 = vrot.slane %v2160_v8, %v5098_v26  ;;  %v1606_v24 = vcombine.high %v1590_v11, %v1590_v11 }
 0x16b   : > { %v1604_v22 = vrot.slane %v1576_v14, %v5098_v26 }
 0x16c   : > { %v2162_v12 = vcombine.low %v1607_v28, %v1590_v11  ;;  %v2183_v15 = vrot.slane %v2161_v13, %v5098_v26  ;;  %v2191_v18 = vcombine.low %v2169_v35, %v2176_v59 }
 0x16d   : > { %v2208_v30 = vcombine.low %v1604_v22, %v1606_v24 }
 0x16e   : > { %v2190_v17 = vrot.slane %v2162_v12, %v5098_v26  ;;  %v2199_v46 = vrot.slane %v2191_v18, %v5098_v26 }
 0x16f   : > { %v2215_v32 = vrot.slane %v2208_v30, %v5098_v26 }
 0x170   : > { %v2192_v25 = vcombine.low %v2183_v15, %v2190_v17 }
 0x171   : > { %v2222_v33 = vrot.slane %v2215_v32, %v5098_v26 }
 0x172   : > { %v2206_v27 = vrot.slane %v2192_v25, %v5098_v26 }
 0x174   : > { %v2207_v31 = vcombine.low %v2199_v46, %v2206_v27 }
 0x176   : > { %4749 = vmatmul.mubr.msk.bf16.gmra.mrb[44].mxu0 %vm2238_vm10, %v2207_v31 }
 0x177   : > { %4752 = vmatprep.mubr.msk.bf16.mxu0 %vm4869_vm1, %v4868_v23 }
 0x17e   : > { %4753 = vmatmul.mubr.msk.bf16.gmra.mrb[48].mxu0 %vm2238_vm10, %v2222_v33 }
 0x186   : > { %v2316_v39 = vpop.f32.mrb[0].mxu0 }
 0x187   : > { %v2317_v16 = vadd.f32 %v5538_v38, %v2316_v39  ;;  %v4706_v43 = vpop.f32.mrb[1].mxu0 }
 0x188   : > { %v2319_v44 = vpop.f32.mrb[2].mxu0 }
 0x189   : > { %v2418_v53 = vmax.f32 %v2317_v16, 0.0  ;;  %v2320_v26 = vadd.f32 %v5538_v38, %v2319_v44  ;;  %v4707_v45 = vpop.f32.mrb[3].mxu0 }
 0x18b   : > { %v2468_v48 = vcombine.high %v2418_v53, %v2418_v53  ;;  %v2475_v50 = vrot.slane %v2418_v53, %v5542_v42  ;;  %v2419_v51 = vmax.f32 %v2320_v26, 0.0 }
 0x18d   : > { %v2482_v9 = vrot.slane %v2468_v48, %v5542_v42  ;;  %v2483_v47 = vcombine.high %v2475_v50, %v2475_v50  ;;  %v2485_v40 = vcombine.high %v2419_v51, %v2419_v51  ;;  %v2492_v52 = vrot.slane %v2419_v51, %v5542_v42 }
 0x18f   : > { %v2484_v20 = vcombine.high %v2482_v9, %v2482_v9  ;;  %v2884_v54 = vcombine.low %v2475_v50, %v2483_v47  ;;  %v2499_v19 = vrot.slane %v2485_v40, %v5542_v42  ;;  %v2500_v55 = vcombine.high %v2492_v52, %v2492_v52 }
 0x191   : > { %v2885_v36 = vcombine.low %v2482_v9, %v2484_v20  ;;  %v2901_v57 = vcombine.low %v2492_v52, %v2500_v55  ;;  %v2892_v10 = vrot.slane %v2884_v54, %v5542_v42  ;;  %v2915_v60 = vrot.slane %v2499_v19, %v5542_v42 }
 0x192   : > { %v2501_v8 = vcombine.high %v2499_v19, %v2499_v19 }
 0x193   : > { %v2899_v58 = vrot.slane %v2885_v36, %v5542_v42  ;;  %v2908_v0 = vrot.slane %v2901_v57, %v5542_v42 }
 0x195   : > { %v2900_v61 = vcombine.low %v2892_v10, %v2899_v58  ;;  %v2916_v29 = vcombine.low %v2908_v0, %v2915_v60 }
 0x197   : > { %v5553_v62 = vpack.c.bf16 %v2916_v29, %v2900_v61  ;;  %v2324_v63 = vpop.f32.mrb[4].mxu0 }
 0x198   : > { %v2325_v41 = vadd.f32 %v5538_v38, %v2324_v63  ;;  %v4710_v1 = vpop.f32.mrb[5].mxu0 }
 0x199   : > { %v2327_v21 = vpop.f32.mrb[6].mxu0  ;;  %v3508_v3 = vrot.slane %v5553_v62, 1  ;;  %v3391_v4 = vshll.u32 %v5553_v62, 16  ;;  %v3389_v7 = vshrl.u32 %v5553_v62, 16 }
 0x19a   : > { %v2420_v6 = vmax.f32 %v2325_v41, 0.0  ;;  %v2328_v49 = vadd.f32 %v5538_v38, %v2327_v21  ;;  %v4711_v5 = vpop.f32.mrb[7].mxu0 }
 0x19b   : > { %3520 = vrot.lane.b32.xlu1 %v3508_v3, %s4865_s29  ;;  %v3393_v56 = vrot.slane %v3391_v4, 1 }
 0x19c   : > { %v2502_v11 = vcombine.high %v2420_v6, %v2420_v6  ;;  %v2509_v28 = vrot.slane %v2420_v6, %v5542_v42  ;;  %v2421_v13 = vmax.f32 %v2328_v49, 0.0 }
 0x19d   : > { %v3394_v59 = vor.u32 %v3393_v56, %v3389_v7 }
 0x19e   : > { %v2516_v35 = vrot.slane %v2502_v11, %v5542_v42  ;;  %v2517_v14 = vcombine.high %v2509_v28, %v2509_v28  ;;  %v2917_v12 = vcombine.low %v2501_v8, %v2509_v28  ;;  %v2526_v15 = vrot.slane %v2421_v13, %v5542_v42 }
 0x19f   : > { %3472 = vrot.lane.b32.xlu0 %v3394_v59, %s4861_s25  ;;  %v2519_v46 = vcombine.high %v2421_v13, %v2421_v13 }
 0x1a0   : > { %v2918_v17 = vcombine.low %v2517_v14, %v2516_v35  ;;  %v2518_v18 = vcombine.high %v2516_v35, %v2516_v35  ;;  %v2534_v22 = vcombine.high %v2526_v15, %v2526_v15  ;;  %v2925_v24 = vrot.slane %v2917_v12, %v5542_v42 }
 0x1a1   : > { %v2533_v33 = vrot.slane %v2519_v46, %v5542_v42 }
 0x1a2   : > { %v2932_v25 = vrot.slane %v2918_v17, %v5542_v42  ;;  %v2934_v27 = vcombine.low %v2518_v18, %v2526_v15  ;;  %v2948_v32 = vrot.slane %v2534_v22, %v5542_v42  ;;  %v4846_v18 = vld [vmem:[%s6157_s3] sm:$0xff]  }
 0x1a3   : > { %v2535_v44 = vcombine.high %v2533_v33, %v2533_v33  ;;  %4757 = vmatpush3.bf16.msra.mxu1 %v4846_v18 }
 0x1a4   : > { %v2933_v30 = vcombine.low %v2925_v24, %v2932_v25  ;;  %v2941_v31 = vrot.slane %v2934_v27, %v5542_v42  ;;  %4758 = vmatprep.subr.bf16.mxu1 %v4868_v23 }
 0x1a5   : > { %v2950_v20 = vcombine.low %v2533_v33, %v2535_v44 }
 0x1a6   : > { %v2949_v34 = vcombine.low %v2941_v31, %v2948_v32 }
 0x1a7   : > { %v2332_v2 = vpop.f32.mrb[8].mxu0  ;;  %v2958_v58 = vrot.slane %v2950_v20, %v5542_v42 }
 0x1a8   : > { %v5570_v37 = vpack.c.bf16 %v2949_v34, %v2933_v30  ;;  %v2333_v39 = vadd.f32 %v5538_v38, %v2332_v2  ;;  %v4714_v16 = vpop.f32.mrb[9].mxu0  ;;  %v4847_v2 = vld [vmem:[%s6157_s3 + $0x8] sm:$0xff]  }
 0x1a9   : > { %v2335_v43 = vpop.f32.mrb[10].mxu0  ;;  %4759 = vmatpush3.bf16.msra.mxu1 %v4847_v2 }
 0x1aa   : > { %v2422_v53 = vmax.f32 %v2333_v39, 0.0  ;;  %v2336_v26 = vadd.f32 %v5538_v38, %v2335_v43  ;;  %3545 = vrot.lane.b32.xlu1 %v5570_v37, %s4862_s26  ;;  %v4715_v45 = vpop.f32.mrb[11].mxu0  ;;  %v3509_v48 = vrot.slane %v5570_v37, 1  ;;  %v3398_v50 = vshll.u32 %v5570_v37, 16  ;;  %4760 = vmatprep.subr.bf16.mxu1 %v4868_v23 }
 0x1ab   : > { %v3396_v40 = vshrl.u32 %v5570_v37, 16 }
 0x1ac   : > { %v2536_v51 = vcombine.high %v2422_v53, %v2422_v53  ;;  %v2543_v9 = vrot.slane %v2422_v53, %v5542_v42  ;;  %v2423_v47 = vmax.f32 %v2336_v26, 0.0  ;;  %3522 = vrot.lane.b32.xlu0 %v3509_v48, %s4865_s29  ;;  %v3400_v52 = vrot.slane %v3398_v50, 1  ;;  %v4848_v26 = vld [vmem:[%s6157_s3 + $0x10] sm:$0xff]  }
 0x1ad   : > { %4761 = vmatpush3.bf16.msra.mxu1 %v4848_v26 }
 0x1ae   : > { %v2550_v54 = vrot.slane %v2536_v51, %v5542_v42  ;;  %v2551_v19 = vcombine.high %v2543_v9, %v2543_v9  ;;  %3601 = vrot.lane.b32.xlu1 %v3509_v48, %s4872_s15  ;;  %v3401_v55 = vor.u32 %v3400_v52, %v3396_v40  ;;  %v2560_v10 = vrot.slane %v2423_v47, %v5542_v42  ;;  %v4849_v40 = vld [vmem:[%s6157_s3 + $0x18] sm:$0xff]  }
 0x1af   : > { %v2553_v61 = vcombine.high %v2423_v47, %v2423_v47  ;;  %4762 = vmatprep.subr.bf16.mxu1 %v4868_v23 }
 0x1b0   : > { %v2552_v36 = vcombine.high %v2550_v54, %v2550_v54  ;;  %v2951_v57 = vcombine.low %v2543_v9, %v2551_v19  ;;  %3474 = vrot.lane.b32.xlu0 %v3401_v55, %s4861_s25  ;;  %v2981_v41 = vrot.slane %v2560_v10, %v5542_v42  ;;  %v2568_v3 = vcombine.high %v2560_v10, %v2560_v10 }
 0x1b1   : > { %v2567_v21 = vrot.slane %v2553_v61, %v5542_v42  ;;  %4763 = vmatpush3.bf16.msra.mxu1 %v4849_v40 }
 0x1b2   : > { %v2965_v0 = vrot.slane %v2951_v57, %v5542_v42  ;;  %v2967_v60 = vcombine.low %v2550_v54, %v2552_v36  ;;  %3576 = vrot.lane.b32.xlu1 %v3401_v55, %s4867_s6  ;;  %4764 = vmatprep.subr.bf16.mxu1 %v4868_v23 }
 0x1b3   : > { %v2983_v28 = vcombine.low %v2568_v3, %v2567_v21  ;;  %v2569_v59 = vcombine.high %v2567_v21, %v2567_v21 }
 0x1b4   : > { %v2966_v29 = vcombine.low %v2958_v58, %v2965_v0  ;;  %v2974_v63 = vrot.slane %v2967_v60, %v5542_v42  ;;  %v4850_v58 = vld [vmem:[%s6157_s3 + $0x20] ss:$0 sps:$4 sm:$0xff]  }
 0x1b5   : > { %v2991_v27 = vrot.slane %v2983_v28, %v5542_v42 }
 0x1b6   : > { %v2982_v1 = vcombine.low %v2974_v63, %v2981_v41  ;;  %v4332_v41 = vsel %vm4330_vm11, %v4850_v58, 0 }
 0x1b7   : > { %4765 = vmatpush3.bf16.msra.mxu1 %v4332_v41 }
 0x1b8   : > { %v2340_v4 = vpop.f32.mrb[12].mxu0  ;;  %v5591_v6 = vpack.c.bf16 %v2982_v1, %v2966_v29 }
 0x1b9   : > { %v2341_v49 = vadd.f32 %v5538_v38, %v2340_v4  ;;  %v4718_v5 = vpop.f32.mrb[13].mxu0 }
 0x1ba   : > { %v2343_v7 = vpop.f32.mrb[14].mxu0  ;;  %3626 = vrot.lane.b32.xlu1 %v5591_v6, %s4873_s16  ;;  %3547 = vrot.lane.b32.xlu0 %v5591_v6, %s4862_s26  ;;  %v3405_v13 = vshll.u32 %v5591_v6, 16  ;;  %v3510_v12 = vrot.slane %v5591_v6, 1  ;;  %v3403_v46 = vshrl.u32 %v5591_v6, 16 }
 0x1bb   : > { %v2424_v56 = vmax.f32 %v2341_v49, 0.0  ;;  %v2344_v8 = vadd.f32 %v5538_v38, %v2343_v7  ;;  %v4719_v11 = vpop.f32.mrb[15].mxu0 }
 0x1bc   : > { %v3407_v17 = vrot.slane %v3405_v13, 1 }
 0x1bd   : > { %v2570_v35 = vcombine.high %v2424_v56, %v2424_v56  ;;  %v2577_v14 = vrot.slane %v2424_v56, %v5542_v42  ;;  %v2425_v15 = vmax.f32 %v2344_v8, 0.0 }
 0x1be   : > { %3682 = vrot.lane.b32.xlu1 %v3510_v12, %s4874_s21  ;;  %3603 = vrot.lane.b32.xlu0 %v3510_v12, %s4872_s15  ;;  %v3408_v33 = vor.u32 %v3407_v17, %v3403_v46 }
 0x1bf   : > { %v2584_v22 = vrot.slane %v2570_v35, %v5542_v42  ;;  %v2585_v24 = vcombine.high %v2577_v14, %v2577_v14  ;;  %v2984_v25 = vcombine.low %v2569_v59, %v2577_v14  ;;  %v2587_v34 = vcombine.high %v2425_v15, %v2425_v15 }
 0x1c0   : > { %v2594_v48 = vrot.slane %v2425_v15, %v5542_v42 }
 0x1c1   : > { %v2586_v30 = vcombine.high %v2584_v22, %v2584_v22  ;;  %v2998_v31 = vrot.slane %v2984_v25, %v5542_v42  ;;  %v3000_v32 = vcombine.low %v2585_v24, %v2584_v22  ;;  %v2601_v53 = vrot.slane %v2587_v34, %v5542_v42 }
 0x1c2   : > { %3657 = vrot.lane.b32.xlu1 %v3408_v33, %s4875_s24  ;;  %3524 = vrot.lane.b32.xlu0 %v3510_v12, %s4865_s29  ;;  %v2602_v54 = vcombine.high %v2594_v48, %v2594_v48 }
 0x1c3   : > { %v2999_v39 = vcombine.low %v2991_v27, %v2998_v31  ;;  %v3007_v16 = vrot.slane %v3000_v32, %v5542_v42  ;;  %v3014_v43 = vrot.slane %v2586_v30, %v5542_v42  ;;  %v2603_v9 = vcombine.high %v2601_v53, %v2601_v53 }
 0x1c4   : > { %v3016_v1 = vcombine.low %v2594_v48, %v2602_v54 }
 0x1c5   : > { %v3015_v44 = vcombine.low %v3007_v16, %v3014_v43  ;;  %v3017_v0 = vcombine.low %v2601_v53, %v2603_v9 }
 0x1c6   : > { %3578 = vrot.lane.b32.xlu0 %v3408_v33, %s4867_s6  ;;  %v3024_v13 = vrot.slane %v3016_v1, %v5542_v42 }
 0x1c7   : > { %v5624_v45 = vpack.c.bf16 %v3015_v44, %v2999_v39  ;;  %v3031_v7 = vrot.slane %v3017_v0, %v5542_v42 }
 0x1c9   : > { %v3511_v50 = vrot.slane %v5624_v45, 1  ;;  %v3412_v51 = vshll.u32 %v5624_v45, 16  ;;  %v2348_v47 = vpop.f32.mrb[16].mxu0  ;;  %v3410_v60 = vshrl.u32 %v5624_v45, 16  ;;  %v3032_v15 = vcombine.low %v3024_v13, %v3031_v7 }
 0x1ca   : > { %v2349_v52 = vadd.f32 %v5538_v38, %v2348_v47  ;;  %v4722_v20 = vpop.f32.mrb[17].mxu0  ;;  %3628 = vrot.lane.b32.xlu0 %v5624_v45, %s4873_s16 }
 0x1cb   : > { %3684 = vrot.lane.b32.xlu1 %v3511_v50, %s4874_s21  ;;  %v2351_v19 = vpop.f32.mrb[18].mxu0  ;;  %v3414_v55 = vrot.slane %v3412_v51, 1 }
 0x1cc   : > { %v2426_v36 = vmax.f32 %v2349_v52, 0.0  ;;  %v2352_v57 = vadd.f32 %v5538_v38, %v2351_v19  ;;  %v4723_v10 = vpop.f32.mrb[19].mxu0 }
 0x1cd   : > { %v3415_v21 = vor.u32 %v3414_v55, %v3410_v60 }
 0x1ce   : > { %v2604_v61 = vcombine.high %v2426_v36, %v2426_v36  ;;  %v2611_v29 = vrot.slane %v2426_v36, %v5542_v42  ;;  %v2427_v63 = vmax.f32 %v2352_v57, 0.0  ;;  %3476 = vrot.lane.b32.xlu0 %v3408_v33, %s4861_s25 }
 0x1cf   : > { %3526 = vrot.lane.b32.xlu1 %v3511_v50, %s4865_s29 }
 0x1d0   : > { %v2618_v3 = vrot.slane %v2604_v61, %v5542_v42  ;;  %v2619_v4 = vcombine.high %v2611_v29, %v2611_v29  ;;  %v2621_v49 = vcombine.high %v2427_v63, %v2427_v63  ;;  %v2628_v5 = vrot.slane %v2427_v63, %v5542_v42 }
 0x1d2   : > { %v3033_v56 = vcombine.low %v2611_v29, %v2619_v4  ;;  %v2620_v8 = vcombine.high %v2618_v3, %v2618_v3  ;;  %v2635_v11 = vrot.slane %v2621_v49, %v5542_v42  ;;  %v2636_v28 = vcombine.high %v2628_v5, %v2628_v5  ;;  %3549 = vrot.lane.b32.xlu0 %v5624_v45, %s4862_s26 }
 0x1d3   : > { %3659 = vrot.lane.b32.xlu1 %v3415_v21, %s4875_s24  ;;  %v3047_v35 = vrot.slane %v2618_v3, %v5542_v42 }
 0x1d4   : > { %v3040_v59 = vrot.slane %v3033_v56, %v5542_v42  ;;  %v3049_v14 = vcombine.low %v2620_v8, %v2628_v5  ;;  %v3050_v12 = vcombine.low %v2636_v28, %v2635_v11  ;;  %v2637_v16 = vcombine.high %v2635_v11, %v2635_v11 }
 0x1d6   : > { %v3048_v17 = vcombine.low %v3040_v59, %v3047_v35  ;;  %v3057_v18 = vrot.slane %v3049_v14, %v5542_v42  ;;  %v3064_v22 = vrot.slane %v3050_v12, %v5542_v42  ;;  %3605 = vrot.lane.b32.xlu0 %v3511_v50, %s4872_s15 }
 0x1d7   : > { %3580 = vrot.lane.b32.xlu1 %v3415_v21, %s4867_s6 }
 0x1d8   : > { %v5661_v24 = vpack.c.bf16 %v3048_v17, %v3032_v15  ;;  %v3065_v25 = vcombine.low %v3057_v18, %v3064_v22 }
 0x1d9   : > { %v2356_v46 = vpop.f32.mrb[20].mxu0 }
 0x1da   : > { %v2357_v27 = vadd.f32 %v5538_v38, %v2356_v46  ;;  %v4726_v30 = vpop.f32.mrb[21].mxu0  ;;  %3478 = vrot.lane.b32.xlu0 %v3415_v21, %s4861_s25  ;;  %v3419_v32 = vshll.u32 %v5661_v24, 16  ;;  %v3512_v39 = vrot.slane %v5661_v24, 1  ;;  %v3417_v54 = vshrl.u32 %v5661_v24, 16 }
 0x1db   : > { %3630 = vrot.lane.b32.xlu1 %v5661_v24, %s4873_s16  ;;  %v2359_v31 = vpop.f32.mrb[22].mxu0 }
 0x1dc   : > { %v2428_v33 = vmax.f32 %v2357_v27, 0.0  ;;  %v2360_v34 = vadd.f32 %v5538_v38, %v2359_v31  ;;  %v4727_v2 = vpop.f32.mrb[23].mxu0  ;;  %v3421_v26 = vrot.slane %v3419_v32, 1 }
 0x1de   : > { %v2638_v43 = vcombine.high %v2428_v33, %v2428_v33  ;;  %v2645_v44 = vrot.slane %v2428_v33, %v5542_v42  ;;  %v2429_v53 = vmax.f32 %v2360_v34, 0.0  ;;  %3551 = vrot.lane.b32.xlu0 %v5661_v24, %s4862_s26  ;;  %v3422_v10 = vor.u32 %v3421_v26, %v3417_v54 }
 0x1df   : > { %3686 = vrot.lane.b32.xlu1 %v3512_v39, %s4874_s21 }
 0x1e0   : > { %v2652_v48 = vrot.slane %v2638_v43, %v5542_v42  ;;  %v2653_v50 = vcombine.high %v2645_v44, %v2645_v44  ;;  %v3066_v51 = vcombine.low %v2637_v16, %v2645_v44  ;;  %v2655_v9 = vcombine.high %v2429_v53, %v2429_v53 }
 0x1e1   : > { %v2662_v47 = vrot.slane %v2429_v53, %v5542_v42 }
 0x1e2   : > { %v2654_v40 = vcombine.high %v2652_v48, %v2652_v48  ;;  %v3073_v52 = vrot.slane %v3066_v51, %v5542_v42  ;;  %v3080_v20 = vrot.slane %v2653_v50, %v5542_v42  ;;  %v2669_v19 = vrot.slane %v2655_v9, %v5542_v42  ;;  %3607 = vrot.lane.b32.xlu0 %v3512_v39, %s4872_s15 }
 0x1e3   : > { %3528 = vrot.lane.b32.xlu1 %v3512_v39, %s4865_s29  ;;  %v2670_v55 = vcombine.high %v2662_v47, %v2662_v47 }
 0x1e4   : > { %v3081_v36 = vcombine.low %v3073_v52, %v3080_v20  ;;  %v3082_v57 = vcombine.low %v2652_v48, %v2654_v40  ;;  %v2671_v61 = vcombine.high %v2669_v19, %v2669_v19 }
 0x1e5   : > { %v3083_v58 = vcombine.low %v2662_v47, %v2670_v55 }
 0x1e6   : > { %v3090_v0 = vrot.slane %v3082_v57, %v5542_v42  ;;  %v5683_v60 = vpack.c.bf16 %v3081_v36, %v3065_v25  ;;  %3661 = vrot.lane.b32.xlu0 %v3422_v10, %s4875_s24  ;;  %v3099_v4 = vcombine.low %v2669_v19, %v2671_v61 }
 0x1e7   : > { %3582 = vrot.lane.b32.xlu1 %v3422_v10, %s4867_s6  ;;  %v3097_v29 = vrot.slane %v3083_v58, %v5542_v42 }
 0x1e8   : > { %v3426_v1 = vshll.u32 %v5683_v60, 16  ;;  %v3513_v8 = vrot.slane %v5683_v60, 1  ;;  %v3106_v35 = vrot.slane %v3099_v4, %v5542_v42  ;;  %v3424_v14 = vshrl.u32 %v5683_v60, 16 }
 0x1e9   : > { %v3098_v63 = vcombine.low %v3090_v0, %v3097_v29  ;;  %v2364_v41 = vpop.f32.mrb[24].mxu0 }
 0x1ea   : > { %v2365_v21 = vadd.f32 %v5538_v38, %v2364_v41  ;;  %v4730_v3 = vpop.f32.mrb[25].mxu0  ;;  %3480 = vrot.lane.b32.xlu0 %v3422_v10, %s4861_s25  ;;  %v3428_v11 = vrot.slane %v3426_v1, 1 }
 0x1eb   : > { %3632 = vrot.lane.b32.xlu1 %v5683_v60, %s4873_s16  ;;  %v2367_v49 = vpop.f32.mrb[26].mxu0 }
 0x1ec   : > { %v2430_v5 = vmax.f32 %v2365_v21, 0.0  ;;  %v2368_v7 = vadd.f32 %v5538_v38, %v2367_v49  ;;  %v4731_v56 = vpop.f32.mrb[27].mxu0  ;;  %v3429_v25 = vor.u32 %v3428_v11, %v3424_v14 }
 0x1ee   : > { %v2672_v28 = vcombine.high %v2430_v5, %v2430_v5  ;;  %v2679_v13 = vrot.slane %v2430_v5, %v5542_v42  ;;  %v2431_v59 = vmax.f32 %v2368_v7, 0.0  ;;  %3530 = vrot.lane.b32.xlu0 %v3513_v8, %s4865_s29 }
 0x1ef   : > { %3553 = vrot.lane.b32.xlu1 %v5683_v60, %s4862_s26 }
 0x1f0   : > { %v2686_v12 = vrot.slane %v2672_v28, %v5542_v42  ;;  %v2687_v15 = vcombine.high %v2679_v13, %v2679_v13  ;;  %v3113_v17 = vrot.slane %v2679_v13, %v5542_v42  ;;  %v2689_v18 = vcombine.high %v2431_v59, %v2431_v59 }
 0x1f1   : > { %v2696_v22 = vrot.slane %v2431_v59, %v5542_v42 }
 0x1f2   : > { %v3114_v46 = vcombine.low %v3106_v35, %v3113_v17  ;;  %v3115_v27 = vcombine.low %v2687_v15, %v2686_v12  ;;  %v2688_v30 = vcombine.high %v2686_v12, %v2686_v12  ;;  %v2703_v31 = vrot.slane %v2689_v18, %v5542_v42  ;;  %3663 = vrot.lane.b32.xlu0 %v3429_v25, %s4875_s24 }
 0x1f3   : > { %3688 = vrot.lane.b32.xlu1 %v3513_v8, %s4874_s21  ;;  %v2704_v32 = vcombine.high %v2696_v22, %v2696_v22 }
 0x1f4   : > { %v5707_v33 = vpack.c.bf16 %v3114_v46, %v3098_v63  ;;  %v2705_v34 = vcombine.high %v2703_v31, %v2703_v31  ;;  %v3116_v2 = vcombine.low %v2688_v30, %v2696_v22  ;;  %v3123_v16 = vrot.slane %v3115_v27, %v5542_v42 }
 0x1f5   : > { %v3132_v39 = vcombine.low %v2704_v32, %v2703_v31 }
 0x1f6   : > { %v3130_v43 = vrot.slane %v3116_v2, %v5542_v42  ;;  %v3146_v44 = vrot.slane %v2705_v34, %v5542_v42  ;;  %3482 = vrot.lane.b32.xlu0 %v3429_v25, %s4861_s25  ;;  %v3433_v51 = vshll.u32 %v5707_v33, 16  ;;  %v3514_v9 = vrot.slane %v5707_v33, 1 }
 0x1f7   : > { %3609 = vrot.lane.b32.xlu1 %v3513_v8, %s4872_s15  ;;  %v3139_v53 = vrot.slane %v3132_v39, %v5542_v42  ;;  %v3431_v40 = vshrl.u32 %v5707_v33, 16 }
 0x1f8   : > { %v3131_v26 = vcombine.low %v3123_v16, %v3130_v43  ;;  %v3435_v47 = vrot.slane %v3433_v51, 1 }
 0x1f9   : > { %v3147_v48 = vcombine.low %v3139_v53, %v3146_v44 }
 0x1fa   : > { %3555 = vrot.lane.b32.xlu0 %v5707_v33, %s4862_s26  ;;  %v3436_v52 = vor.u32 %v3435_v47, %v3431_v40 }
 0x1fb   : > { %3584 = vrot.lane.b32.xlu1 %v3429_v25, %s4867_s6  ;;  %v5716_v50 = vpack.c.bf16 %v3147_v48, %v3131_v26 }
 0x1fd   : > { %v3515_v36 = vrot.slane %v5716_v50, 1  ;;  %v3440_v57 = vshll.u32 %v5716_v50, 16  ;;  %v3438_v49 = vshrl.u32 %v5716_v50, 16 }
 0x1fe   : > { %3611 = vrot.lane.b32.xlu0 %v3514_v9, %s4872_s15 }
 0x1ff   : > { %3634 = vrot.lane.b32.xlu1 %v5707_v33, %s4873_s16  ;;  %v3442_v41 = vrot.slane %v3440_v57, 1 }
 0x201   : > { %v3443_v11 = vor.u32 %v3442_v41, %v3438_v49 }
 0x202   : > { %3532 = vrot.lane.b32.xlu0 %v3514_v9, %s4865_s29 }
 0x203   : > { %3690 = vrot.lane.b32.xlu1 %v3514_v9, %s4874_s21 }
 0x206   : > { %v2372_v20 = vpop.f32.mrb[28].mxu0  ;;  %3586 = vrot.lane.b32.xlu0 %v3436_v52, %s4867_s6 }
 0x207   : > { %3665 = vrot.lane.b32.xlu1 %v3436_v52, %s4875_s24  ;;  %v2373_v54 = vadd.f32 %v5538_v38, %v2372_v20  ;;  %v4734_v19 = vpop.f32.mrb[29].mxu0 }
 0x208   : > { %v2375_v55 = vpop.f32.mrb[30].mxu0 }
 0x209   : > { %v2432_v10 = vmax.f32 %v2373_v54, 0.0  ;;  %v2376_v58 = vadd.f32 %v5538_v38, %v2375_v55  ;;  %v4735_v0 = vpop.f32.mrb[31].mxu0 }
 0x20a   : > { %3636 = vrot.lane.b32.xlu0 %v5716_v50, %s4873_s16 }
 0x20b   : > { %3692 = vrot.lane.b32.xlu1 %v3515_v36, %s4874_s21  ;;  %v2706_v61 = vcombine.high %v2432_v10, %v2432_v10  ;;  %v2713_v29 = vrot.slane %v2432_v10, %v5542_v42  ;;  %v2433_v63 = vmax.f32 %v2376_v58, 0.0 }
 0x20d   : > { %v2720_v1 = vrot.slane %v2706_v61, %v5542_v42  ;;  %v2721_v21 = vcombine.high %v2713_v29, %v2713_v29  ;;  %v2723_v3 = vcombine.high %v2433_v63, %v2433_v63  ;;  %v2730_v4 = vrot.slane %v2433_v63, %v5542_v42  ;;  %v5755_v25 = vpop.permute.xlu1 %3520 }
 0x20e   : > { %3484 = vrot.lane.b32.xlu0 %v3436_v52, %s4861_s25 }
 0x20f   : > { %3534 = vrot.lane.b32.xlu1 %v3515_v36, %s4865_s29  ;;  %v2722_v5 = vcombine.high %v2720_v1, %v2720_v1  ;;  %v3148_v7 = vcombine.low %v2713_v29, %v2721_v21  ;;  %v2737_v56 = vrot.slane %v2723_v3, %v5542_v42  ;;  %v2738_v8 = vcombine.high %v2730_v4, %v2730_v4 }
 0x211   : > { %v3149_v28 = vcombine.low %v2720_v1, %v2722_v5  ;;  %v3165_v13 = vcombine.low %v2730_v4, %v2738_v8  ;;  %v3156_v59 = vrot.slane %v3148_v7, %v5542_v42  ;;  %v3179_v12 = vrot.slane %v2737_v56, %v5542_v42  ;;  %v3473_v48 = vpop.permute.xlu0 %3472 }
 0x212   : > { %3557 = vrot.lane.b32.xlu0 %v5716_v50, %s4862_s26  ;;  %v2739_v2 = vcombine.high %v2737_v56, %v2737_v56 }
 0x213   : > { %3667 = vrot.lane.b32.xlu1 %v3443_v11, %s4875_s24  ;;  %v3163_v35 = vrot.slane %v3149_v28, %v5542_v42  ;;  %v3172_v14 = vrot.slane %v3165_v13, %v5542_v42 }
 0x215   : > { %v3164_v15 = vcombine.low %v3156_v59, %v3163_v35  ;;  %v3180_v17 = vcombine.low %v3172_v14, %v3179_v12 }
 0x216   : > { %3613 = vrot.lane.b32.xlu0 %v3515_v36, %s4872_s15 }
 0x217   : > { %3588 = vrot.lane.b32.xlu1 %v3443_v11, %s4867_s6  ;;  %v5752_v18 = vpack.c.bf16 %v3180_v17, %v3164_v15  ;;  %v2380_v22 = vpop.f32.mrb[32].mxu0 }
 0x218   : > { %v2381_v46 = vadd.f32 %v5538_v38, %v2380_v22  ;;  %v4738_v27 = vpop.f32.mrb[33].mxu0 }
 0x219   : > { %v2383_v30 = vpop.f32.mrb[34].mxu0  ;;  %v3516_v39 = vrot.slane %v5752_v18, 1  ;;  %v3447_v26 = vshll.u32 %v5752_v18, 16  ;;  %v3445_v36 = vshrl.u32 %v5752_v18, 16 }
 0x21a   : > { %v2434_v31 = vmax.f32 %v2381_v46, 0.0  ;;  %v2384_v32 = vadd.f32 %v5538_v38, %v2383_v30  ;;  %v4739_v34 = vpop.f32.mrb[35].mxu0  ;;  %3486 = vrot.lane.b32.xlu0 %v3443_v11, %s4861_s25 }
 0x21b   : > { %3638 = vrot.lane.b32.xlu1 %v5752_v18, %s4873_s16  ;;  %v3449_v54 = vrot.slane %v3447_v26, 1 }
 0x21c   : > { %v2740_v16 = vcombine.high %v2434_v31, %v2434_v31  ;;  %v2747_v43 = vrot.slane %v2434_v31, %v5542_v42  ;;  %v2435_v44 = vmax.f32 %v2384_v32, 0.0  ;;  %v5764_v53 = vpop.permute.xlu1 %3545 }
 0x21d   : > { %v3450_v1 = vor.u32 %v3449_v54, %v3445_v36 }
 0x21e   : > { %v2754_v51 = vrot.slane %v2740_v16, %v5542_v42  ;;  %v2755_v9 = vcombine.high %v2747_v43, %v2747_v43  ;;  %v3181_v47 = vcombine.low %v2739_v2, %v2747_v43  ;;  %v2764_v40 = vrot.slane %v2435_v44, %v5542_v42  ;;  %3559 = vrot.lane.b32.xlu0 %v5752_v18, %s4862_s26  ;;  %v5772_v55 = vpop.permute.xlu0 %3522 }
 0x21f   : > { %3694 = vrot.lane.b32.xlu1 %v3516_v39, %s4874_s21  ;;  %v2757_v58 = vcombine.high %v2435_v44, %v2435_v44  ;;  %v3707_v2 = vsel %vm719_vm3, %v5553_v62, %v3473_v48 }
 0x220   : > { %v3182_v52 = vcombine.low %v2755_v9, %v2754_v51  ;;  %v2756_v20 = vcombine.high %v2754_v51, %v2754_v51  ;;  %v2772_v19 = vcombine.high %v2764_v40, %v2764_v40  ;;  %v3189_v57 = vrot.slane %v3181_v47, %v5542_v42  ;;  %v5777_v61 = vpop.permute.xlu1 %3601 }
 0x221   : > { %v2771_v21 = vrot.slane %v2757_v58, %v5542_v42 }
 0x222   : > { %v3196_v10 = vrot.slane %v3182_v52, %v5542_v42  ;;  %v3198_v0 = vcombine.low %v2756_v20, %v2764_v40  ;;  %3615 = vrot.lane.b32.xlu0 %v3516_v39, %s4872_s15  ;;  %v3212_v41 = vrot.slane %v2772_v19, %v5542_v42  ;;  %v3475_v4 = vpop.permute.xlu0 %3474  ;;  %v3731_v40 = vsel %vm777_vm5, %v3707_v2, %v5755_v25 }
 0x223   : > { %3536 = vrot.lane.b32.xlu1 %v3516_v39, %s4865_s29  ;;  %v2773_v28 = vcombine.high %v2771_v21, %v2771_v21  ;;  %v3755_v48 = vsel %vm835_vm7, %v3731_v40, %v5764_v53 }
 0x224   : > { %v3197_v29 = vcombine.low %v3189_v57, %v3196_v10  ;;  %v3205_v63 = vrot.slane %v3198_v0, %v5542_v42  ;;  %v3577_v7 = vpop.permute.xlu1 %3576 }
 0x225   : > { %v3214_v31 = vcombine.low %v2771_v21, %v2773_v28  ;;  %v3779_v54 = vsel %vm893_vm9, %v3755_v48, %v3577_v7 }
 0x226   : > { %v3213_v3 = vcombine.low %v3205_v63, %v3212_v41  ;;  %3669 = vrot.lane.b32.xlu0 %v3450_v1, %s4875_s24  ;;  %v3709_v41 = vsel %vm719_vm3, %v5570_v37, %v3475_v4 }
 0x227   : > { %3590 = vrot.lane.b32.xlu1 %v3450_v1, %s4867_s6  ;;  %v2388_v49 = vpop.f32.mrb[36].mxu0  ;;  %v3222_v47 = vrot.slane %v3214_v31, %v5542_v42  ;;  %v3733_v37 = vsel %vm777_vm5, %v3709_v41, %v5772_v55 }
 0x228   : > { %v5786_v5 = vpack.c.bf16 %v3213_v3, %v3197_v29  ;;  %v2389_v56 = vadd.f32 %v5538_v38, %v2388_v49  ;;  %v4742_v8 = vpop.f32.mrb[37].mxu0  ;;  %v3804_v29 = vsel %vm3802_vm12, %v3779_v54, %v5777_v61 }
 0x229   : > { %v2391_v11 = vpop.f32.mrb[38].mxu0 }
 0x22a   : > { %v2436_v13 = vmax.f32 %v2389_v56, 0.0  ;;  %v2392_v59 = vadd.f32 %v5538_v38, %v2391_v11  ;;  %v4743_v35 = vpop.f32.mrb[39].mxu0  ;;  %3488 = vrot.lane.b32.xlu0 %v3450_v1, %s4861_s25  ;;  %v3454_v14 = vshll.u32 %v5786_v5, 16  ;;  %v3517_v27 = vrot.slane %v5786_v5, 1 }
 0x22b   : > { %3640 = vrot.lane.b32.xlu1 %v5786_v5, %s4873_s16  ;;  %v3452_v39 = vshrl.u32 %v5786_v5, 16 }
 0x22c   : > { %v2774_v12 = vcombine.high %v2436_v13, %v2436_v13  ;;  %v2781_v15 = vrot.slane %v2436_v13, %v5542_v42  ;;  %v2437_v17 = vmax.f32 %v2392_v59, 0.0  ;;  %v3627_v22 = vpop.permute.xlu1 %3626  ;;  %v5795_v46 = vpop.permute.xlu0 %3547  ;;  %v3456_v30 = vrot.slane %v3454_v14, 1 }
 0x22d   : > { %v3829_v21 = vsel %vm3827_vm13, %v3804_v29, %v3627_v22 }
 0x22e   : > { %v2788_v32 = vrot.slane %v2774_v12, %v5542_v42  ;;  %v2789_v34 = vcombine.high %v2781_v15, %v2781_v15  ;;  %3538 = vrot.lane.b32.xlu0 %v3517_v27, %s4865_s29  ;;  %v2798_v44 = vrot.slane %v2437_v17, %v5542_v42  ;;  %v3457_v9 = vor.u32 %v3456_v30, %v3452_v39 }
 0x22f   : > { %3561 = vrot.lane.b32.xlu1 %v5786_v5, %s4862_s26  ;;  %v2791_v20 = vcombine.high %v2437_v17, %v2437_v17 }
 0x230   : > { %v2790_v16 = vcombine.high %v2788_v32, %v2788_v32  ;;  %v3215_v43 = vcombine.low %v2781_v15, %v2789_v34  ;;  %v3683_v26 = vpop.permute.xlu1 %3682  ;;  %v5806_v51 = vpop.permute.xlu0 %3603  ;;  %v3245_v57 = vrot.slane %v2798_v44, %v5542_v42  ;;  %v2806_v0 = vcombine.high %v2798_v44, %v2798_v44 }
 0x231   : > { %v2805_v53 = vrot.slane %v2791_v20, %v5542_v42 }
 0x232   : > { %v3229_v52 = vrot.slane %v3215_v43, %v5542_v42  ;;  %v3231_v62 = vcombine.low %v2788_v32, %v2790_v16  ;;  %3671 = vrot.lane.b32.xlu0 %v3457_v9, %s4875_s24 }
 0x233   : > { %3696 = vrot.lane.b32.xlu1 %v3517_v27, %s4874_s21  ;;  %v3247_v13 = vcombine.low %v2806_v0, %v2805_v53  ;;  %v2807_v4 = vcombine.high %v2805_v53, %v2805_v53 }
 0x234   : > { %v3230_v19 = vcombine.low %v3222_v47, %v3229_v52  ;;  %v3238_v36 = vrot.slane %v3231_v62, %v5542_v42  ;;  %v5819_v25 = vpop.permute.xlu0 %3524  ;;  %v3658_v58 = vpop.permute.xlu1 %3657 }
 0x235   : > { %v3854_v7 = vsel %vm3852_vm14, %v3829_v21, %v3658_v58  ;;  %v3255_v32 = vrot.slane %v3247_v13, %v5542_v42  ;;  %v4851_v13 = vld [vmem:[%s6156_s2] ss:$0 sm:$0xff] }
 0x236   : > { %v3246_v10 = vcombine.low %v3238_v36, %v3245_v57  ;;  %3490 = vrot.lane.b32.xlu0 %v3457_v9, %s4861_s25  ;;  %v3879_v59 = vsel %vm3877_vm15, %v3854_v7, %v3683_v26 }
 0x237   : > { %3617 = vrot.lane.b32.xlu1 %v3517_v27, %s4872_s15  ;;  %v3921_v34 = vrot.slane %v3879_v59, %v5542_v42  ;;  %v3914_v48 = vcombine.high %v3879_v59, %v3879_v59 }
 0x238   : > { %v2396_v63 = vpop.f32.mrb[40].mxu0  ;;  %v5828_v1 = vpack.c.bf16 %v3246_v10, %v3230_v19  ;;  %v3579_v56 = vpop.permute.xlu0 %3578 }
 0x239   : > { %v2397_v3 = vadd.f32 %v5538_v38, %v2396_v63  ;;  %v4746_v49 = vpop.f32.mrb[41].mxu0  ;;  %v3929_v20 = vcombine.high %v3921_v34, %v3921_v34 }
 0x23a   : > { %v2399_v8 = vpop.f32.mrb[42].mxu0  ;;  %3563 = vrot.lane.b32.xlu0 %v5828_v1, %s4862_s26  ;;  %v3461_v15 = vshll.u32 %v5828_v1, 16  ;;  %v3518_v22 = vrot.slane %v5828_v1, 1 }
 0x23b   : > { %v2438_v11 = vmax.f32 %v2397_v3, 0.0  ;;  %v2400_v61 = vadd.f32 %v5538_v38, %v2399_v8  ;;  %3592 = vrot.lane.b32.xlu1 %v3457_v9, %s4867_s6  ;;  %v4747_v28 = vpop.f32.mrb[43].mxu0  ;;  %v3757_v38 = vsel %vm835_vm7, %v3733_v37, %v5795_v46  ;;  %v3459_v9 = vshrl.u32 %v5828_v1, 16 }
 0x23c   : > { %v3629_v17 = vpop.permute.xlu0 %3628  ;;  %v3781_v2 = vsel %vm893_vm9, %v3757_v38, %v3579_v56  ;;  %v3463_v44 = vrot.slane %v3461_v15, 1  ;;  %v4122_v41 = vcombine.low %v3921_v34, %v3929_v20 }
 0x23d   : > { %v2808_v35 = vcombine.high %v2438_v11, %v2438_v11  ;;  %v2815_v14 = vrot.slane %v2438_v11, %v5542_v42  ;;  %v3685_v12 = vpop.permute.xlu1 %3684  ;;  %v2439_v31 = vmax.f32 %v2400_v61, 0.0  ;;  %v3806_v54 = vsel %vm3802_vm12, %v3781_v2, %v5806_v51 }
 0x23e   : > { %3619 = vrot.lane.b32.xlu0 %v3518_v22, %s4872_s15  ;;  %v3831_v36 = vsel %vm3827_vm13, %v3806_v54, %v3629_v17  ;;  %v3464_v10 = vor.u32 %v3463_v44, %v3459_v9  ;;  %v3928_v51 = vrot.slane %v3914_v48, %v5542_v42  ;;  %v4130_v59 = vrot.slane %v4122_v41, %v5542_v42 }
 0x23f   : > { %v2822_v55 = vrot.slane %v2808_v35, %v5542_v42  ;;  %v2823_v27 = vcombine.high %v2815_v14, %v2815_v14  ;;  %v3248_v30 = vcombine.low %v2807_v4, %v2815_v14  ;;  %3642 = vrot.lane.b32.xlu1 %v5828_v1, %s4873_s16  ;;  %v2825_v62 = vcombine.high %v2439_v31, %v2439_v31 }
 0x240   : > { %v3477_v26 = vpop.permute.xlu0 %3476  ;;  %v2832_v21 = vrot.slane %v2439_v31, %v5542_v42 }
 0x241   : > { %v2824_v46 = vcombine.high %v2822_v55, %v2822_v55  ;;  %v3262_v39 = vrot.slane %v3248_v30, %v5542_v42  ;;  %v3264_v16 = vcombine.low %v2823_v27, %v2822_v55  ;;  %v5853_v43 = vpop.permute.xlu1 %3526  ;;  %v2839_v29 = vrot.slane %v2825_v62, %v5542_v42 }
 0x242   : > { %3540 = vrot.lane.b32.xlu0 %v3518_v22, %s4865_s29  ;;  %v2840_v35 = vcombine.high %v2832_v21, %v2832_v21 }
 0x243   : > { %v3263_v47 = vcombine.low %v3255_v32, %v3262_v39  ;;  %v3271_v40 = vrot.slane %v3264_v16, %v5542_v42  ;;  %v3278_v52 = vrot.slane %v2824_v46, %v5542_v42  ;;  %3698 = vrot.lane.b32.xlu1 %v3518_v22, %s4874_s21  ;;  %v2841_v28 = vcombine.high %v2839_v29, %v2839_v29 }
 0x244   : > { %v5863_v58 = vpop.permute.xlu0 %3549  ;;  %v3280_v39 = vcombine.low %v2832_v21, %v2840_v35  ;;  %v3711_v16 = vsel %vm719_vm3, %v5591_v6, %v3477_v26 }
 0x245   : > { %v3279_v19 = vcombine.low %v3271_v40, %v3278_v52  ;;  %v3660_v57 = vpop.permute.xlu1 %3659  ;;  %v3281_v32 = vcombine.low %v2839_v29, %v2841_v28 }
 0x246   : > { %v3856_v53 = vsel %vm3852_vm14, %v3831_v36, %v3660_v57  ;;  %3594 = vrot.lane.b32.xlu0 %v3464_v10, %s4867_s6  ;;  %v3288_v57 = vrot.slane %v3280_v39, %v5542_v42 }
 0x247   : > { %v5866_v0 = vpack.c.bf16 %v3279_v19, %v3263_v47  ;;  %v5870_v63 = vsel %vm3877_vm15, %v3856_v53, %v3685_v12  ;;  %3673 = vrot.lane.b32.xlu1 %v3464_v10, %s4875_s24  ;;  %v3295_v6 = vrot.slane %v3281_v32, %v5542_v42 }
 0x248   : > { %v5877_v3 = vrot.slane %v5870_v63, %v5542_v42  ;;  %v5885_v11 = vpop.permute.xlu0 %3605  ;;  %v3930_v35 = vcombine.high %v5870_v63, %v5870_v63 }
 0x249   : > { %v3581_v49 = vpop.permute.xlu1 %3580  ;;  %v5881_v7 = vrot.slane %v5866_v0, 1  ;;  %v3468_v56 = vshll.u32 %v5866_v0, 16  ;;  %v2404_v61 = vpop.f32.mrb[44].mxu0  ;;  %v3466_v31 = vshrl.u32 %v5866_v0, 16 }
 0x24a   : > { %v4123_v8 = vcombine.low %v3928_v51, %v5877_v3  ;;  %v2405_v37 = vadd.f32 %v4851_v13, %v2404_v61  ;;  %v4750_v4 = vpop.f32.mrb[45].mxu0  ;;  %3644 = vrot.lane.b32.xlu0 %v5866_v0, %s4873_s16 }
 0x24b   : > { %3700 = vrot.lane.b32.xlu1 %v5881_v7, %s4874_s21  ;;  %v2407_v12 = vpop.f32.mrb[46].mxu0  ;;  %v3470_v15 = vrot.slane %v3468_v56, 1 }
 0x24c   : > { %v4137_v14 = vrot.slane %v4123_v8, %v5542_v42  ;;  %v2440_v38 = vmax.f32 %v2405_v37, 0.0  ;;  %v2408_v17 = vadd.f32 %v4851_v13, %v2407_v12  ;;  %v4751_v22 = vpop.f32.mrb[47].mxu0  ;;  %v5896_v27 = vpop.permute.xlu0 %3478 }
 0x24d   : > { %v3631_v55 = vpop.permute.xlu1 %3630  ;;  %v3471_v44 = vor.u32 %v3470_v15, %v3466_v31 }
 0x24e   : > { %v4138_v30 = vcombine.low %v4130_v59, %v4137_v14  ;;  %v2842_v34 = vcombine.high %v2440_v38, %v2440_v38  ;;  %v2849_v2 = vrot.slane %v2440_v38, %v5542_v42  ;;  %v2441_v46 = vmax.f32 %v2408_v17, 0.0  ;;  %3492 = vrot.lane.b32.xlu0 %v3464_v10, %s4861_s25 }
 0x24f   : > { %3542 = vrot.lane.b32.xlu1 %v5881_v7, %s4865_s29  ;;  %v3735_v10 = vsel %vm777_vm5, %v3711_v16, %v5819_v25  ;;  %v3296_v59 = vcombine.low %v3288_v57, %v3295_v6  ;;  %s4802_s29 = smul.u32 192, %s6161_s19 }
 0x250   : > { %4767 = vmatmul.mubr.msk.bf16.vlgmr.msra.gmra.mrb[0].mxu1 %vm4302_vm0, %v4138_v30  ;;  %v2856_v9 = vrot.slane %v2842_v34, %v5542_v42  ;;  %v2857_v47 = vcombine.high %v2849_v2, %v2849_v2  ;;  %v2859_v40 = vcombine.high %v2441_v46, %v2441_v46  ;;  %v2866_v52 = vrot.slane %v2441_v46, %v5542_v42  ;;  %v5910_v48 = vpop.permute.xlu0 %3551 }
 0x251   : > { %v3687_v62 = vpop.permute.xlu1 %3686  ;;  %4770 = vmatprep.mubr.msk.bf16.mxu1 %vm4869_vm1, %v4868_v23  ;;  %v2412_v20 = vpop.f32.mrb[48].mxu0  ;;  %v3759_v41 = vsel %vm835_vm7, %v3735_v10, %v5863_v58  ;;  %v3945_v46 = vcombine.high %v5877_v3, %v5877_v3  ;;  %s6109_s13 = scalar_lea.vmem %s6159_s5, %s4802_s29 }
 0x252   : > { %v3297_v26 = vcombine.low %v2849_v2, %v2857_v47  ;;  %v2858_v54 = vcombine.high %v2856_v9, %v2856_v9  ;;  %v2873_v19 = vrot.slane %v2859_v40, %v5542_v42  ;;  %v4754_v36 = vpop.f32.mrb[49].mxu0  ;;  %v2874_v53 = vcombine.high %v2866_v52, %v2866_v52  ;;  %3565 = vrot.lane.b32.xlu0 %v5866_v0, %s4862_s26 }
 0x253   : > { %3675 = vrot.lane.b32.xlu1 %v3471_v44, %s4875_s24  ;;  %v2413_v29 = vadd.f32 %v4851_v13, %v2412_v20  ;;  %v2415_v51 = vpop.f32.mrb[50].mxu0  ;;  %v3311_v56 = vrot.slane %v2856_v9, %v5542_v42  ;;  %v3783_v37 = vsel %vm893_vm9, %v3759_v41, %v3581_v49  ;;  %v3944_v2 = vrot.slane %v3930_v35, %v5542_v42 }
 0x254   : > { %v3304_v21 = vrot.slane %v3297_v26, %v5542_v42  ;;  %v3313_v8 = vcombine.low %v2858_v54, %v2866_v52  ;;  %v4755_v61 = vpop.f32.mrb[51].mxu0  ;;  %v3314_v25 = vcombine.low %v2874_v53, %v2873_v19  ;;  %v3608_v13 = vpop.permute.xlu0 %3607  ;;  %v2875_v15 = vcombine.high %v2873_v19, %v2873_v19 }
 0x255   : > { %v5924_v28 = vpop.permute.xlu1 %3528  ;;  %v2442_v4 = vmax.f32 %v2413_v29, 0.0  ;;  %v3808_v17 = vsel %vm3802_vm12, %v3783_v37, %v5885_v11  ;;  %v3713_v9 = vsel %vm719_vm3, %v5624_v45, %v5896_v27  ;;  %v4139_v26 = vcombine.low %v3945_v46, %v3944_v2 }
 0x256   : > { %v3312_v14 = vcombine.low %v3304_v21, %v3311_v56  ;;  %v3321_v58 = vrot.slane %v3313_v8, %v5542_v42  ;;  %v3328_v12 = vrot.slane %v3314_v25, %v5542_v42  ;;  %3621 = vrot.lane.b32.xlu0 %v5881_v7, %s4872_s15  ;;  %v3833_v63 = vsel %vm3827_vm13, %v3808_v17, %v3631_v55 }
 0x257   : > { %3596 = vrot.lane.b32.xlu1 %v3471_v44, %s4867_s6  ;;  %v2882_v38 = vrot.slane %v2442_v4, %v5542_v42  ;;  %v4147_v41 = vrot.slane %v4139_v26, %v5542_v42 }
 0x258   : > { %v3386_v49 = vpack.c.bf16 %v3312_v14, %v3296_v59  ;;  %v3329_v30 = vcombine.low %v3321_v58, %v3328_v12  ;;  %v3662_v34 = vpop.permute.xlu0 %3661 }
 0x259   : > { %v3583_v22 = vpop.permute.xlu1 %3582  ;;  %v2883_v31 = vcombine.high %v2882_v38, %v2882_v38  ;;  %v3330_v32 = vcombine.low %v2875_v15, %v2882_v38  ;;  %v3858_v39 = vsel %vm3852_vm14, %v3833_v63, %v3662_v34 }
 0x25a   : > { %v3883_v16 = vsel %vm3877_vm15, %v3858_v39, %v3687_v62  ;;  %3494 = vrot.lane.b32.xlu0 %v3471_v44, %s4861_s25  ;;  %v3572_v55 = vshll.u32 %v3386_v49, 16  ;;  %v3600_v40 = vrot.slane %v3386_v49, 1  ;;  %v3570_v19 = vshrl.u32 %v3386_v49, 16 }
 0x25b   : > { %3646 = vrot.lane.b32.xlu1 %v3386_v49, %s4873_s16  ;;  %v3337_v7 = vrot.slane %v3330_v32, %v5542_v42  ;;  %v3344_v11 = vrot.slane %v2883_v31, %v5542_v42  ;;  %v3953_v47 = vrot.slane %v3883_v16, %v5542_v42  ;;  %v3737_v44 = vsel %vm777_vm5, %v3713_v9, %v5853_v43 }
 0x25c   : > { %v3481_v20 = vpop.permute.xlu0 %3480  ;;  %v3574_v6 = vrot.slane %v3572_v55, 1  ;;  %v3761_v45 = vsel %vm835_vm7, %v3737_v44, %v5910_v48  ;;  %v3946_v43 = vcombine.high %v3883_v16, %v3883_v16 }
 0x25d   : > { %v3633_v3 = vpop.permute.xlu1 %3632  ;;  %v3345_v52 = vcombine.low %v3337_v7, %v3344_v11  ;;  %v3961_v54 = vcombine.high %v3953_v47, %v3953_v47  ;;  %v3785_v10 = vsel %vm893_vm9, %v3761_v45, %v3583_v22  ;;  %v3715_v2 = vsel %vm719_vm3, %v5661_v24, %v3481_v20 }
 0x25e   : > { %3567 = vrot.lane.b32.xlu0 %v3386_v49, %s4862_s26  ;;  %v3575_v57 = vor.u32 %v3574_v6, %v3570_v19  ;;  %v3810_v21 = vsel %vm3802_vm12, %v3785_v10, %v3608_v13  ;;  %v3960_v13 = vrot.slane %v3946_v43, %v5542_v42  ;;  %v3739_v11 = vsel %vm777_vm5, %v3715_v2, %v5924_v28 }
 0x25f   : > { %3702 = vrot.lane.b32.xlu1 %v3600_v40, %s4874_s21  ;;  %v3387_v62 = vpack.c.bf16 %v3345_v52, %v3329_v30  ;;  %v4140_v27 = vcombine.low %v3953_v47, %v3961_v54  ;;  %v3835_v8 = vsel %vm3827_vm13, %v3810_v21, %v3633_v3 }
 0x260   : > { %v3531_v53 = vpop.permute.xlu0 %3530 }
 0x261   : > { %v3554_v36 = vpop.permute.xlu1 %3553  ;;  %v3653_v29 = vshll.u32 %v3387_v62, 16  ;;  %v4154_v51 = vrot.slane %v4140_v27, %v5542_v42  ;;  %v3651_v59 = vshrl.u32 %v3387_v62, 16  ;;  %v3681_v12 = vrot.slane %v3387_v62, 1 }
 0x262   : > { %3677 = vrot.lane.b32.xlu0 %v3575_v57, %s4875_s24  ;;  %v3763_v16 = vsel %vm835_vm7, %v3739_v11, %v3554_v36 }
 0x263   : > { %3598 = vrot.lane.b32.xlu1 %v3575_v57, %s4867_s6  ;;  %v4155_v48 = vcombine.low %v4147_v41, %v4154_v51  ;;  %v3655_v37 = vrot.slane %v3653_v29, 1 }
 0x264   : > { %v3664_v61 = vpop.permute.xlu0 %3663 }
 0x265   : > { %v3689_v56 = vpop.permute.xlu1 %3688  ;;  %v3860_v25 = vsel %vm3852_vm14, %v3835_v8, %v3664_v61  ;;  %4771 = vmatmul.mubr.msk.bf16.gmra.mrb[4].mxu1 %vm4302_vm0, %v4155_v48  ;;  %v3656_v38 = vor.u32 %v3655_v37, %v3651_v59 }
 0x266   : > { %v3885_v4 = vsel %vm3877_vm15, %v3860_v25, %v3689_v56  ;;  %3623 = vrot.lane.b32.xlu0 %v3600_v40, %s4872_s15  ;;  %4774 = vmatprep.mubr.msk.bf16.mxu1 %vm4869_vm1, %v4868_v23 }
 0x267   : > { %3648 = vrot.lane.b32.xlu1 %v3387_v62, %s4873_s16  ;;  %v3962_v35 = vcombine.high %v3885_v4, %v3885_v4  ;;  %v3969_v14 = vrot.slane %v3885_v4, %v5542_v42 }
 0x268   : > { %v3483_v15 = vpop.permute.xlu0 %3482 }
 0x269   : > { %v3610_v58 = vpop.permute.xlu1 %3609  ;;  %v3976_v49 = vrot.slane %v3962_v35, %v5542_v42  ;;  %v3977_v17 = vcombine.high %v3969_v14, %v3969_v14  ;;  %v4156_v22 = vcombine.low %v3960_v13, %v3969_v14  ;;  %v3717_v28 = vsel %vm719_vm3, %v5683_v60, %v3483_v15 }
 0x26a   : > { %3679 = vrot.lane.b32.xlu0 %v3656_v38, %s4875_s24  ;;  %v3741_v19 = vsel %vm777_vm5, %v3717_v28, %v3531_v53 }
 0x26b   : > { %3704 = vrot.lane.b32.xlu1 %v3681_v12, %s4874_s21  ;;  %v4157_v30 = vcombine.low %v3977_v17, %v3976_v49  ;;  %v4164_v32 = vrot.slane %v4156_v22, %v5542_v42 }
 0x26c   : > { %v3556_v31 = vpop.permute.xlu0 %3555 }
 0x26d   : > { %v3585_v63 = vpop.permute.xlu1 %3584  ;;  %v4171_v34 = vrot.slane %v4157_v30, %v5542_v42  ;;  %v3765_v44 = vsel %vm835_vm7, %v3741_v19, %v3556_v31 }
 0x26e   : > { %v3787_v55 = vsel %vm893_vm9, %v3763_v16, %v3585_v63 }
 0x26f   : > { %v4172_v39 = vcombine.low %v4164_v32, %v4171_v34  ;;  %v3812_v3 = vsel %vm3802_vm12, %v3787_v55, %v3610_v58 }
 0x270   : > { %v3612_v7 = vpop.permute.xlu0 %3611 }
 0x271   : > { %v3635_v46 = vpop.permute.xlu1 %3634  ;;  %4775 = vmatmul.mubr.msk.bf16.gmra.mrb[8].mxu1 %vm4302_vm0, %v4172_v39 }
 0x272   : > { %4778 = vmatprep.mubr.msk.bf16.mxu1 %vm4869_vm1, %v4868_v23  ;;  %v3837_v24 = vsel %vm3827_vm13, %v3812_v3, %v3635_v46 }
 0x274   : > { %v3533_v47 = vpop.permute.xlu0 %3532 }
 0x275   : > { %v3691_v9 = vpop.permute.xlu1 %3690 }
 0x278   : > { %v3587_v52 = vpop.permute.xlu0 %3586 }
 0x279   : > { %v3666_v40 = vpop.permute.xlu1 %3665  ;;  %v3789_v45 = vsel %vm893_vm9, %v3765_v44, %v3587_v52 }
 0x27a   : > { %v3862_v20 = vsel %vm3852_vm14, %v3837_v24, %v3666_v40  ;;  %v3814_v29 = vsel %vm3802_vm12, %v3789_v45, %v3612_v7 }
 0x27b   : > { %v3887_v6 = vsel %vm3877_vm15, %v3862_v20, %v3691_v9 }
 0x27c   : > { %v3637_v54 = vpop.permute.xlu0 %3636  ;;  %v3985_v62 = vrot.slane %v3887_v6, %v5542_v42  ;;  %v3978_v57 = vcombine.high %v3887_v6, %v3887_v6 }
 0x27d   : > { %v3693_v26 = vpop.permute.xlu1 %3692  ;;  %v3839_v60 = vsel %vm3827_vm13, %v3814_v29, %v3637_v54 }
 0x27e   : > { %v3993_v10 = vcombine.high %v3985_v62, %v3985_v62  ;;  %v3992_v21 = vrot.slane %v3978_v57, %v5542_v42 }
 0x280   : > { %v3485_v36 = vpop.permute.xlu0 %3484  ;;  %v4173_v56 = vcombine.low %v3985_v62, %v3993_v10 }
 0x281   : > { %v3535_v27 = vpop.permute.xlu1 %3534  ;;  %v3719_v14 = vsel %vm719_vm3, %v5707_v33, %v3485_v36 }
 0x282   : > { %v4181_v25 = vrot.slane %v4173_v56, %v5542_v42  ;;  %v3743_v15 = vsel %vm777_vm5, %v3719_v14, %v3533_v47 }
 0x284   : > { %v3558_v41 = vpop.permute.xlu0 %3557 }
 0x285   : > { %v3668_v51 = vpop.permute.xlu1 %3667  ;;  %v3767_v38 = vsel %vm835_vm7, %v3743_v15, %v3558_v41 }
 0x286   : > { %v3864_v43 = vsel %vm3852_vm14, %v3839_v60, %v3668_v51 }
 0x287   : > { %v3889_v53 = vsel %vm3877_vm15, %v3864_v43, %v3693_v26 }
 0x288   : > { %v4001_v48 = vrot.slane %v3889_v53, %v5542_v42  ;;  %v3614_v37 = vpop.permute.xlu0 %3613  ;;  %v3994_v30 = vcombine.high %v3889_v53, %v3889_v53 }
 0x289   : > { %v3589_v8 = vpop.permute.xlu1 %3588 }
 0x28a   : > { %v4174_v61 = vcombine.low %v3992_v21, %v4001_v48  ;;  %v3791_v17 = vsel %vm893_vm9, %v3767_v38, %v3589_v8  ;;  %v4008_v34 = vrot.slane %v3994_v30, %v5542_v42  ;;  %v4009_v2 = vcombine.high %v4001_v48, %v4001_v48 }
 0x28b   : > { %v3816_v63 = vsel %vm3802_vm12, %v3791_v17, %v3614_v37 }
 0x28c   : > { %v4188_v4 = vrot.slane %v4174_v61, %v5542_v42  ;;  %v3487_v13 = vpop.permute.xlu0 %3486  ;;  %v4190_v9 = vcombine.low %v4009_v2, %v4008_v34 }
 0x28d   : > { %v3639_v59 = vpop.permute.xlu1 %3638  ;;  %v3721_v7 = vsel %vm719_vm3, %v5716_v50, %v3487_v13 }
 0x28e   : > { %v4189_v35 = vcombine.low %v4181_v25, %v4188_v4  ;;  %v3841_v32 = vsel %vm3827_vm13, %v3816_v63, %v3639_v59  ;;  %v3745_v3 = vsel %vm777_vm5, %v3721_v7, %v3535_v27  ;;  %v4198_v26 = vrot.slane %v4190_v9, %v5542_v42 }
 0x290   : > { %4779 = vmatmul.mubr.msk.bf16.gmra.mrb[12].mxu1 %vm4302_vm0, %v4189_v35  ;;  %v3560_v12 = vpop.permute.xlu0 %3559 }
 0x291   : > { %v3695_v58 = vpop.permute.xlu1 %3694  ;;  %4782 = vmatprep.mubr.msk.bf16.mxu1 %vm4869_vm1, %v4868_v23  ;;  %v3769_v24 = vsel %vm835_vm7, %v3745_v3, %v3560_v12 }
 0x294   : > { %v3616_v22 = vpop.permute.xlu0 %3615 }
 0x295   : > { %v3537_v49 = vpop.permute.xlu1 %3536 }
 0x298   : > { %v3670_v33 = vpop.permute.xlu0 %3669 }
 0x299   : > { %v3591_v31 = vpop.permute.xlu1 %3590  ;;  %v3866_v46 = vsel %vm3852_vm14, %v3841_v32, %v3670_v33 }
 0x29a   : > { %v3891_v39 = vsel %vm3877_vm15, %v3866_v46, %v3695_v58  ;;  %v3793_v20 = vsel %vm893_vm9, %v3769_v24, %v3591_v31 }
 0x29b   : > { %v4017_v11 = vrot.slane %v3891_v39, %v5542_v42  ;;  %v4010_v50 = vcombine.high %v3891_v39, %v3891_v39  ;;  %v3818_v54 = vsel %vm3802_vm12, %v3793_v20, %v3616_v22 }
 0x29c   : > { %v3489_v55 = vpop.permute.xlu0 %3488 }
 0x29d   : > { %v3641_v16 = vpop.permute.xlu1 %3640  ;;  %v4025_v47 = vcombine.high %v4017_v11, %v4017_v11  ;;  %v4024_v57 = vrot.slane %v4010_v50, %v5542_v42  ;;  %v3723_v37 = vsel %vm719_vm3, %v5752_v18, %v3489_v55 }
 0x29e   : > { %v3843_v62 = vsel %vm3827_vm13, %v3818_v54, %v3641_v16  ;;  %v3747_v13 = vsel %vm777_vm5, %v3723_v37, %v3537_v49 }
 0x29f   : > { %v4191_v40 = vcombine.low %v4017_v11, %v4025_v47 }
 0x2a0   : > { %v3539_v28 = vpop.permute.xlu0 %3538 }
 0x2a1   : > { %v3562_v52 = vpop.permute.xlu1 %3561  ;;  %v4205_v6 = vrot.slane %v4191_v40, %v5542_v42 }
 0x2a2   : > { %v3771_v35 = vsel %vm835_vm7, %v3747_v13, %v3562_v52 }
 0x2a3   : > { %v4206_v44 = vcombine.low %v4198_v26, %v4205_v6 }
 0x2a4   : > { %v3672_v45 = vpop.permute.xlu0 %3671 }
 0x2a5   : > { %v3697_v19 = vpop.permute.xlu1 %3696  ;;  %v3868_v27 = vsel %vm3852_vm14, %v3843_v62, %v3672_v45  ;;  %4783 = vmatmul.mubr.msk.bf16.gmra.mrb[16].mxu1 %vm4302_vm0, %v4206_v44 }
 0x2a6   : > { %v3893_v36 = vsel %vm3877_vm15, %v3868_v27, %v3697_v19  ;;  %4786 = vmatprep.mubr.msk.bf16.mxu1 %vm4869_vm1, %v4868_v23 }
 0x2a7   : > { %v4026_v10 = vcombine.high %v3893_v36, %v3893_v36  ;;  %v4033_v29 = vrot.slane %v3893_v36, %v5542_v42 }
 0x2a8   : > { %v3491_v51 = vpop.permute.xlu0 %3490 }
 0x2a9   : > { %v3618_v60 = vpop.permute.xlu1 %3617  ;;  %v4040_v41 = vrot.slane %v4026_v10, %v5542_v42  ;;  %v4041_v43 = vcombine.high %v4033_v29, %v4033_v29  ;;  %v4207_v53 = vcombine.low %v4024_v57, %v4033_v29  ;;  %v3725_v49 = vsel %vm719_vm3, %v5786_v5, %v3491_v51 }
 0x2aa   : > { %v3749_v32 = vsel %vm777_vm5, %v3725_v49, %v3539_v28 }
 0x2ab   : > { %v4208_v21 = vcombine.low %v4041_v43, %v4040_v41  ;;  %v4215_v8 = vrot.slane %v4207_v53, %v5542_v42 }
 0x2ac   : > { %v3564_v48 = vpop.permute.xlu0 %3563 }
 0x2ad   : > { %v3593_v56 = vpop.permute.xlu1 %3592  ;;  %v4222_v61 = vrot.slane %v4208_v21, %v5542_v42  ;;  %v3773_v33 = vsel %vm835_vm7, %v3749_v32, %v3564_v48 }
 0x2ae   : > { %v3795_v14 = vsel %vm893_vm9, %v3771_v35, %v3593_v56 }
 0x2af   : > { %v4223_v4 = vcombine.low %v4215_v8, %v4222_v61  ;;  %v3820_v15 = vsel %vm3802_vm12, %v3795_v14, %v3618_v60 }
 0x2b0   : > { %v3620_v59 = vpop.permute.xlu0 %3619 }
 0x2b1   : > { %v3643_v25 = vpop.permute.xlu1 %3642  ;;  %4787 = vmatmul.mubr.msk.bf16.gmra.mrb[20].mxu1 %vm4302_vm0, %v4223_v4 }
 0x2b2   : > { %4790 = vmatprep.mubr.msk.bf16.mxu1 %vm4869_vm1, %v4868_v23  ;;  %v3845_v18 = vsel %vm3827_vm13, %v3820_v15, %v3643_v25 }
 0x2b4   : > { %v3541_v12 = vpop.permute.xlu0 %3540 }
 0x2b5   : > { %v3699_v58 = vpop.permute.xlu1 %3698 }
 0x2b8   : > { %v3595_v17 = vpop.permute.xlu0 %3594 }
 0x2b9   : > { %v3674_v38 = vpop.permute.xlu1 %3673  ;;  %v3797_v2 = vsel %vm893_vm9, %v3773_v33, %v3595_v17 }
 0x2ba   : > { %v3870_v22 = vsel %vm3852_vm14, %v3845_v18, %v3674_v38  ;;  %v3822_v16 = vsel %vm3802_vm12, %v3797_v2, %v3620_v59 }
 0x2bb   : > { %v3895_v30 = vsel %vm3877_vm15, %v3870_v22, %v3699_v58 }
 0x2bc   : > { %v3645_v31 = vpop.permute.xlu0 %3644  ;;  %v4049_v34 = vrot.slane %v3895_v30, %v5542_v42  ;;  %v4042_v7 = vcombine.high %v3895_v30, %v3895_v30 }
 0x2bd   : > { %v3701_v63 = vpop.permute.xlu1 %3700  ;;  %v3847_v5 = vsel %vm3827_vm13, %v3822_v16, %v3645_v31  ;;  %v6101_v16 = vld [vmem:[%s6158_s4] ss:$0 sm:$0xff] }
 0x2be   : > { %v4057_v11 = vcombine.high %v4049_v34, %v4049_v34  ;;  %v4056_v24 = vrot.slane %v4042_v7, %v5542_v42 }
 0x2c0   : > { %v3493_v39 = vpop.permute.xlu0 %3492  ;;  %v4224_v40 = vcombine.low %v4049_v34, %v4057_v11 }
 0x2c1   : > { %v3543_v46 = vpop.permute.xlu1 %3542  ;;  %v3727_v54 = vsel %vm719_vm3, %v5828_v1, %v3493_v39 }
 0x2c2   : > { %v4232_v26 = vrot.slane %v4224_v40, %v5542_v42  ;;  %v3751_v45 = vsel %vm777_vm5, %v3727_v54, %v3541_v12 }
 0x2c4   : > { %v3566_v9 = vpop.permute.xlu0 %3565 }
 0x2c5   : > { %v3676_v55 = vpop.permute.xlu1 %3675  ;;  %v3775_v27 = vsel %vm835_vm7, %v3751_v45, %v3566_v9 }
 0x2c6   : > { %v3872_v47 = vsel %vm3852_vm14, %v3847_v5, %v3676_v55 }
 0x2c7   : > { %v3897_v3 = vsel %vm3877_vm15, %v3872_v47, %v3701_v63 }
 0x2c8   : > { %v4065_v52 = vrot.slane %v3897_v3, %v5542_v42  ;;  %v3622_v6 = vpop.permute.xlu0 %3621  ;;  %v4058_v29 = vcombine.high %v3897_v3, %v3897_v3 }
 0x2c9   : > { %v3597_v20 = vpop.permute.xlu1 %3596 }
 0x2ca   : > { %v4225_v28 = vcombine.low %v4056_v24, %v4065_v52  ;;  %v3799_v57 = vsel %vm893_vm9, %v3775_v27, %v3597_v20  ;;  %v4072_v53 = vrot.slane %v4058_v29, %v5542_v42  ;;  %v4073_v21 = vcombine.high %v4065_v52, %v4065_v52 }
 0x2cb   : > { %v3824_v60 = vsel %vm3802_vm12, %v3799_v57, %v3622_v6 }
 0x2cc   : > { %v4239_v50 = vrot.slane %v4225_v28, %v5542_v42  ;;  %v3495_v44 = vpop.permute.xlu0 %3494  ;;  %v4241_v59 = vcombine.low %v4073_v21, %v4072_v53 }
 0x2cd   : > { %v3647_v19 = vpop.permute.xlu1 %3646  ;;  %v3729_v1 = vsel %vm719_vm3, %v5866_v0, %v3495_v44 }
 0x2ce   : > { %v4240_v62 = vcombine.low %v4232_v26, %v4239_v50  ;;  %v3849_v41 = vsel %vm3827_vm13, %v3824_v60, %v3647_v19  ;;  %v3753_v48 = vsel %vm777_vm5, %v3729_v1, %v3543_v46  ;;  %v4249_v22 = vrot.slane %v4241_v59, %v5542_v42 }
 0x2d0   : > { %4791 = vmatmul.mubr.msk.bf16.gmra.mrb[24].mxu1 %vm4302_vm0, %v4240_v62  ;;  %v3568_v10 = vpop.permute.xlu0 %3567 }
 0x2d1   : > { %v3703_v36 = vpop.permute.xlu1 %3702  ;;  %4794 = vmatprep.mubr.msk.bf16.mxu1 %vm4869_vm1, %v4868_v23  ;;  %v3777_v61 = vsel %vm835_vm7, %v3753_v48, %v3568_v10 }
 0x2d4   : > { %v3678_v43 = vpop.permute.xlu0 %3677 }
 0x2d5   : > { %v3599_v51 = vpop.permute.xlu1 %3598  ;;  %v3874_v56 = vsel %vm3852_vm14, %v3849_v41, %v3678_v43 }
 0x2d6   : > { %v3899_v8 = vsel %vm3877_vm15, %v3874_v56, %v3703_v36  ;;  %v3801_v25 = vsel %vm893_vm9, %v3777_v61, %v3599_v51 }
 0x2d7   : > { %v4081_v37 = vrot.slane %v3899_v8, %v5542_v42  ;;  %v4074_v14 = vcombine.high %v3899_v8, %v3899_v8 }
 0x2d8   : > { %v3624_v4 = vpop.permute.xlu0 %3623 }
 0x2d9   : > { %v3649_v0 = vpop.permute.xlu1 %3648  ;;  %v4089_v13 = vcombine.high %v4081_v37, %v4081_v37  ;;  %v3826_v35 = vsel %vm3802_vm12, %v3801_v25, %v3624_v4  ;;  %v4088_v30 = vrot.slane %v4074_v14, %v5542_v42 }
 0x2da   : > { %v3851_v15 = vsel %vm3827_vm13, %v3826_v35, %v3649_v0 }
 0x2db   : > { %v4242_v58 = vcombine.low %v4081_v37, %v4089_v13 }
 0x2dc   : > { %v3680_v18 = vpop.permute.xlu0 %3679 }
 0x2dd   : > { %v3705_v12 = vpop.permute.xlu1 %3704  ;;  %v4256_v38 = vrot.slane %v4242_v58, %v5542_v42  ;;  %v3876_v17 = vsel %vm3852_vm14, %v3851_v15, %v3680_v18 }
 0x2de   : > { %v3901_v49 = vsel %vm3877_vm15, %v3876_v17, %v3705_v12 }
 0x2df   : > { %v4090_v63 = vcombine.high %v3901_v49, %v3901_v49  ;;  %v4097_v31 = vrot.slane %v3901_v49, %v5542_v42  ;;  %v4257_v32 = vcombine.low %v4249_v22, %v4256_v38 }
 0x2e1   : > { %v4104_v33 = vrot.slane %v4090_v63, %v5542_v42  ;;  %v4105_v34 = vcombine.high %v4097_v31, %v4097_v31  ;;  %v4258_v2 = vcombine.low %v4088_v30, %v4097_v31  ;;  %4795 = vmatmul.mubr.msk.bf16.gmra.mrb[28].mxu1 %vm4302_vm0, %v4257_v32 }
 0x2e2   : > { %4798 = vmatprep.mubr.msk.bf16.mxu1 %vm4869_vm1, %v4868_v23 }
 0x2e3   : > { %v4259_v46 = vcombine.low %v4105_v34, %v4104_v33  ;;  %v4266_v39 = vrot.slane %v4258_v2, %v5542_v42 }
 0x2e5   : > { %v4273_v7 = vrot.slane %v4259_v46, %v5542_v42 }
 0x2e7   : > { %v4274_v11 = vcombine.low %v4266_v39, %v4273_v7 }
 0x2e9   : > { %4799 = vmatmul.mubr.msk.bf16.gmra.mrb[32].mxu1 %vm4302_vm0, %v4274_v11 }
 0x323   : > { %v4368_v5 = vpop.f32.mrb[0].mxu1 }
 0x324   : > { %v4369_v55 = vadd.f32 %v6101_v16, %v4368_v5  ;;  %v4768_v9 = vpop.f32.mrb[1].mxu1 }
 0x325   : > { %v4371_v47 = vpop.f32.mrb[2].mxu1 }
 0x326   : > { %v4439_v23 = vmax.f32 %v4369_v55, 0.0  ;;  %v4372_v3 = vadd.f32 %v6101_v16, %v4371_v47  ;;  %v4769_v24 = vpop.f32.mrb[3].mxu1 }
 0x328   : > { %v4475_v42 = vcombine.high %v4439_v23, %v4439_v23  ;;  %v4440_v40 = vmax.f32 %v4372_v3, 0.0 }
 0x32a   : > { %v4499_v52 = vcombine.low %v4439_v23, %v4475_v42  ;;  %4524 = vst [vmem:[%s6109_s13 + $0x8] sm:$0xf] %v4440_v40  ;;  %v4476_v50 = vcombine.high %v4440_v40, %v4440_v40 }
 0x32c   : > { %4523 = vst [vmem:[%s6109_s13] sm:$0xff] %v4499_v52 }
 0x338   : > { %v4376_v20 = vpop.f32.mrb[4].mxu1 }
 0x339   : > { %v4377_v28 = vadd.f32 %v6101_v16, %v4376_v20  ;;  %v4772_v6 = vpop.f32.mrb[5].mxu1 }
 0x33a   : > { %v4379_v26 = vpop.f32.mrb[6].mxu1 }
 0x33b   : > { %v4441_v54 = vmax.f32 %v4377_v28, 0.0  ;;  %v4380_v19 = vadd.f32 %v6101_v16, %v4379_v26  ;;  %v4773_v44 = vpop.f32.mrb[7].mxu1 }
 0x33d   : > { %v4477_v62 = vcombine.high %v4441_v54, %v4441_v54  ;;  %v4500_v45 = vcombine.low %v4476_v50, %v4441_v54  ;;  %v4442_v27 = vmax.f32 %v4380_v19, 0.0 }
 0x33f   : > { %4525 = vst [vmem:[%s6109_s13 + $0x10] sm:$0xff] %v4500_v45  ;;  %4526 = vst [vmem:[%s6109_s13 + $0x18] sm:$0xf] %v4477_v62  ;;  %v4478_v36 = vcombine.high %v4442_v27, %v4442_v27 }
 0x341   : > { %v4501_v57 = vcombine.low %v4442_v27, %v4478_v36 }
 0x343   : > { %4527 = vst [vmem:[%s6109_s13 + $0x20] sm:$0xff] %v4501_v57 }
 0x344   : > { %v4384_v10 = vpop.f32.mrb[8].mxu1 }
 0x345   : > { %v4385_v29 = vadd.f32 %v6101_v16, %v4384_v10  ;;  %v4776_v1 = vpop.f32.mrb[9].mxu1 }
 0x346   : > { %v4387_v60 = vpop.f32.mrb[10].mxu1 }
 0x347   : > { %v4443_v51 = vmax.f32 %v4385_v29, 0.0  ;;  %v4388_v41 = vadd.f32 %v6101_v16, %v4387_v60  ;;  %v4777_v43 = vpop.f32.mrb[11].mxu1 }
 0x349   : > { %v4479_v53 = vcombine.high %v4443_v51, %v4443_v51  ;;  %4528 = vst [vmem:[%s6109_s13 + $0x28] sm:$0xf] %v4443_v51  ;;  %v4444_v21 = vmax.f32 %v4388_v41, 0.0 }
 0x34b   : > { %v4480_v56 = vcombine.high %v4444_v21, %v4444_v21  ;;  %v4502_v48 = vcombine.low %v4479_v53, %v4444_v21 }
 0x34d   : > { %4529 = vst [vmem:[%s6109_s13 + $0x30] sm:$0xff] %v4502_v48  ;;  %4530 = vst [vmem:[%s6109_s13 + $0x38] sm:$0xf] %v4480_v56 }
 0x363   : > { %v4392_v8 = vpop.f32.mrb[12].mxu1 }
 0x364   : > { %v4393_v61 = vadd.f32 %v6101_v16, %v4392_v8  ;;  %v4780_v37 = vpop.f32.mrb[13].mxu1 }
 0x365   : > { %v4395_v0 = vpop.f32.mrb[14].mxu1 }
 0x366   : > { %v4445_v25 = vmax.f32 %v4393_v61, 0.0  ;;  %v4396_v4 = vadd.f32 %v6101_v16, %v4395_v0  ;;  %v4781_v59 = vpop.f32.mrb[15].mxu1 }
 0x368   : > { %v4481_v13 = vcombine.high %v4445_v25, %v4445_v25  ;;  %v4446_v35 = vmax.f32 %v4396_v4, 0.0 }
 0x36a   : > { %v4503_v14 = vcombine.low %v4445_v25, %v4481_v13  ;;  %4532 = vst [vmem:[%s6109_s13 + $0x48] sm:$0xf] %v4446_v35  ;;  %v4482_v38 = vcombine.high %v4446_v35, %v4446_v35 }
 0x36c   : > { %4531 = vst [vmem:[%s6109_s13 + $0x40] sm:$0xff] %v4503_v14 }
 0x378   : > { %v4400_v58 = vpop.f32.mrb[16].mxu1 }
 0x379   : > { %v4401_v12 = vadd.f32 %v6101_v16, %v4400_v58  ;;  %v4784_v15 = vpop.f32.mrb[17].mxu1 }
 0x37a   : > { %v4403_v18 = vpop.f32.mrb[18].mxu1 }
 0x37b   : > { %v4447_v17 = vmax.f32 %v4401_v12, 0.0  ;;  %v4404_v22 = vadd.f32 %v6101_v16, %v4403_v18  ;;  %v4785_v49 = vpop.f32.mrb[19].mxu1 }
 0x37d   : > { %v4483_v30 = vcombine.high %v4447_v17, %v4447_v17  ;;  %v4504_v63 = vcombine.low %v4482_v38, %v4447_v17  ;;  %v4448_v31 = vmax.f32 %v4404_v22, 0.0 }
 0x37f   : > { %4533 = vst [vmem:[%s6109_s13 + $0x50] sm:$0xff] %v4504_v63  ;;  %4534 = vst [vmem:[%s6109_s13 + $0x58] sm:$0xf] %v4483_v30  ;;  %v4484_v32 = vcombine.high %v4448_v31, %v4448_v31 }
 0x381   : > { %v4505_v33 = vcombine.low %v4448_v31, %v4484_v32 }
 0x383   : > { %4535 = vst [vmem:[%s6109_s13 + $0x60] sm:$0xff] %v4505_v33 }
 0x384   : > { %v4408_v34 = vpop.f32.mrb[20].mxu1 }
 0x385   : > { %v4409_v2 = vadd.f32 %v6101_v16, %v4408_v34  ;;  %v4788_v46 = vpop.f32.mrb[21].mxu1 }
 0x386   : > { %v4411_v39 = vpop.f32.mrb[22].mxu1 }
 0x387   : > { %v4449_v7 = vmax.f32 %v4409_v2, 0.0  ;;  %v4412_v11 = vadd.f32 %v6101_v16, %v4411_v39  ;;  %v4789_v5 = vpop.f32.mrb[23].mxu1 }
 0x389   : > { %v4485_v55 = vcombine.high %v4449_v7, %v4449_v7  ;;  %4536 = vst [vmem:[%s6109_s13 + $0x68] sm:$0xf] %v4449_v7  ;;  %v4450_v9 = vmax.f32 %v4412_v11, 0.0 }
 0x38b   : > { %v4486_v47 = vcombine.high %v4450_v9, %v4450_v9  ;;  %v4506_v23 = vcombine.low %v4485_v55, %v4450_v9 }
 0x38d   : > { %4537 = vst [vmem:[%s6109_s13 + $0x70] sm:$0xff] %v4506_v23  ;;  %4538 = vst [vmem:[%s6109_s13 + $0x78] sm:$0xf] %v4486_v47 }
 0x3a3   : > { %v4416_v3 = vpop.f32.mrb[24].mxu1 }
 0x3a4   : > { %v4417_v24 = vadd.f32 %v6101_v16, %v4416_v3  ;;  %v4792_v42 = vpop.f32.mrb[25].mxu1 }
 0x3a5   : > { %v4419_v40 = vpop.f32.mrb[26].mxu1 }
 0x3a6   : > { %v4451_v52 = vmax.f32 %v4417_v24, 0.0  ;;  %v4420_v20 = vadd.f32 %v6101_v16, %v4419_v40  ;;  %v4793_v28 = vpop.f32.mrb[27].mxu1 }
 0x3a8   : > { %v4487_v6 = vcombine.high %v4451_v52, %v4451_v52  ;;  %v4452_v26 = vmax.f32 %v4420_v20, 0.0 }
 0x3aa   : > { %v4507_v50 = vcombine.low %v4451_v52, %v4487_v6  ;;  %4540 = vst [vmem:[%s6109_s13 + $0x88] sm:$0xf] %v4452_v26  ;;  %v4488_v45 = vcombine.high %v4452_v26, %v4452_v26 }
 0x3ac   : > { %4539 = vst [vmem:[%s6109_s13 + $0x80] sm:$0xff] %v4507_v50 }
 0x3b4   : > { %v4424_v54 = vpop.f32.mrb[28].mxu1 }
 0x3b5   : > { %v4425_v19 = vadd.f32 %v6101_v16, %v4424_v54  ;;  %v4796_v44 = vpop.f32.mrb[29].mxu1 }
 0x3b6   : > { %v4427_v62 = vpop.f32.mrb[30].mxu1 }
 0x3b7   : > { %v4453_v27 = vmax.f32 %v4425_v19, 0.0  ;;  %v4428_v36 = vadd.f32 %v6101_v16, %v4427_v62  ;;  %v4797_v57 = vpop.f32.mrb[31].mxu1 }
 0x3b9   : > { %v4489_v10 = vcombine.high %v4453_v27, %v4453_v27  ;;  %v4508_v29 = vcombine.low %v4488_v45, %v4453_v27  ;;  %v4454_v1 = vmax.f32 %v4428_v36, 0.0 }
 0x3bb   : > { %4541 = vst [vmem:[%s6109_s13 + $0x90] sm:$0xff] %v4508_v29  ;;  %4542 = vst [vmem:[%s6109_s13 + $0x98] sm:$0xf] %v4489_v10  ;;  %v4490_v60 = vcombine.high %v4454_v1, %v4454_v1 }
 0x3bc   : > { %v4432_v51 = vpop.f32.mrb[32].mxu1 }
 0x3bd   : > { %v4509_v41 = vcombine.low %v4454_v1, %v4490_v60  ;;  %v4433_v43 = vadd.f32 %v6101_v16, %v4432_v51  ;;  %v4800_v53 = vpop.f32.mrb[33].mxu1 }
 0x3be   : > { %v4435_v21 = vpop.f32.mrb[34].mxu1 }
 0x3bf   : > { %4543 = vst [vmem:[%s6109_s13 + $0xa0] sm:$0xff] %v4509_v41  ;;  %v4455_v56 = vmax.f32 %v4433_v43, 0.0  ;;  %v4436_v48 = vadd.f32 %v6101_v16, %v4435_v21  ;;  %v4801_v8 = vpop.f32.mrb[35].mxu1 }
 0x3c1   : > { %v4491_v61 = vcombine.high %v4455_v56, %v4455_v56  ;;  %4544 = vst [vmem:[%s6109_s13 + $0xa8] sm:$0xf] %v4455_v56  ;;  %v4456_v37 = vmax.f32 %v4436_v48, 0.0 }
 0x3c3   : > { %v4492_v0 = vcombine.high %v4456_v37, %v4456_v37  ;;  %v4510_v25 = vcombine.low %v4491_v61, %v4456_v37 }
 0x3c5   : > { %4545 = vst [vmem:[%s6109_s13 + $0xb0] sm:$0xff] %v4510_v25  ;;  %4546 = vst [vmem:[%s6109_s13 + $0xb8] sm:$0xf] %v4492_v0 }
 0x3c6 PF: > { %s15_s18 = sadd.s32 1, %s4858_s18  }
 0x3c7   : > { %p12_p4 = scmp.ge.s32.totalorder %s15_s18, 4  }
 0x3c9   :  { %14 = sbr.rel (!%p12_p4) target bundleno = 1 (0x1), region = 70 }

</bundles_post_ra>
